<compile_context>
chip_gen: v7x
topology: tpu7x:2x2x1
jax: 0.10.0
libtpu: 0.0.40
codegen_flags: <defaults>
</compile_context>

<pallas_src>
import jax
import jax.numpy as jnp
from jax.experimental import pallas as pl
from jax.experimental.pallas import tpu as pltpu

LANE = 128
SUBLANE = 8


def _round_up(x, m):
    return (x + m - 1) // m * m


# ----------------------------- Fused kernel -----------------------------
def bigru_fused_kernel(ids_ref, emb_ref, w_in_ref, b_in_ref, w_hh_ref,
                       b_hn_f_ref, b_hn_b_ref, wfc_ref, bfc_ref, out_ref):
    LBp = ids_ref.shape[0]          # L * Bp   (Bp = batch padded to multiple of 8)
    V = emb_ref.shape[0]
    Hp = w_hh_ref.shape[0]          # hidden padded to a 128-lane slab
    Bp = out_ref.shape[0]
    L = LBp // Bp

    # --- embedding lookup as a one-hot matmul (bf16 MXU operands, f32 accumulate) ---
    # TODO(synk): for non-toy vocab sizes, replace with a scalar-prefetch HBM gather
    # (PrefetchScalarGridSpec + pl.Element-indexed BlockSpec) instead of one-hot @ table.
    ids = ids_ref[...]                                                     # (L*Bp, 1) int32
    onehot = (ids == jax.lax.broadcasted_iota(jnp.int32, (LBp, V), 1)
              ).astype(jnp.bfloat16)                                       # (L*Bp, V) bf16
    x = jnp.dot(onehot, emb_ref[...],
                preferred_element_type=jnp.float32)                        # (L*Bp, E) f32

    # --- hoisted input projection: all 6 gates in ONE matmul ---
    gi = jnp.dot(x.astype(jnp.bfloat16), w_in_ref[...],
                 preferred_element_type=jnp.float32) + b_in_ref[...]       # (L*Bp, 6*Hp)

    w_hh = w_hh_ref[...]                                                   # (Hp, 3*Hp) bf16
    b_hn_f = jnp.broadcast_to(b_hn_f_ref[...], (Bp, Hp))                   # hoisted broadcast

    # --- forward recurrence, fully unrolled (L small & static) ---
    # TODO(synk): switch to lax.fori_loop(..., unroll=True) if seq_len grows beyond ~16.
    h = jnp.zeros((Bp, Hp), jnp.float32)
    for t in range(L):
        lo = t * Bp                                                        # tile-aligned (Bp % 8 == 0)
        gh = jnp.dot(h.astype(jnp.bfloat16), w_hh,
                     preferred_element_type=jnp.float32)                   # ONE matmul / step
        r = jax.nn.sigmoid(gi[lo:lo + Bp, 0:Hp] + gh[:, 0:Hp])
        z = jax.nn.sigmoid(gi[lo:lo + Bp, Hp:2 * Hp] + gh[:, Hp:2 * Hp])
        n = jnp.tanh(gi[lo:lo + Bp, 2 * Hp:3 * Hp]
                     + r * (gh[:, 2 * Hp:3 * Hp] + b_hn_f))
        h = (1.0 - z) * n + z * h

    # --- backward direction: output[-1] = first reverse step on x[L-1] with h0 = 0 ---
    lo = (L - 1) * Bp
    rb = jax.nn.sigmoid(gi[lo:lo + Bp, 3 * Hp:4 * Hp])
    zb = jax.nn.sigmoid(gi[lo:lo + Bp, 4 * Hp:5 * Hp])
    nb = jnp.tanh(gi[lo:lo + Bp, 5 * Hp:6 * Hp]
                  + rb * jnp.broadcast_to(b_hn_b_ref[...], (Bp, Hp)))
    h_bwd = (1.0 - zb) * nb                                                # + zb * 0

    # --- fused fc: split-slab matmuls (no concat), lane-dense padded output store ---
    out_ref[...] = (jnp.dot(h.astype(jnp.bfloat16), wfc_ref[0],
                            preferred_element_type=jnp.float32)
                    + jnp.dot(h_bwd.astype(jnp.bfloat16), wfc_ref[1],
                              preferred_element_type=jnp.float32)
                    + bfc_ref[...])


# ----------------------------- Wrapper -----------------------------
def bigru_dropout_forward(text, packed, output_dim):
    """text: (L, B) int32 token ids. Returns (B, output_dim) f32."""
    L, B = text.shape
    Bp = _round_up(B, SUBLANE)                 # sublane-align per-timestep row windows
    Hp = packed["w_hh"].shape[0]
    Op = packed["b_fc"].shape[-1]

    text_p = jnp.pad(text, ((0, 0), (0, Bp - B)))            # dummy rows, sliced off below
    ids = text_p.reshape(L * Bp, 1).astype(jnp.int32)        # row t*Bp + b  <->  (t, b)

    vmem = pl.BlockSpec(memory_space=pltpu.MemorySpace.VMEM)
    out_p = pl.pallas_call(
        bigru_fused_kernel,
        out_shape=jax.ShapeDtypeStruct((Bp, Op), jnp.float32),
        in_specs=[vmem] * 9,
        out_specs=vmem,
        compiler_params=pltpu.CompilerParams(vmem_limit_bytes=32 * 1024 * 1024),
    )(ids, packed["embedding"],
      packed["w_in"], packed["b_in"],
      packed["w_hh"], packed["b_hn_fwd"], packed["b_hn_bwd"],
      packed["w_fc"], packed["b_fc"])
    # TODO(synk): on v7x, add a batch grid axis with dimension_semantics=("parallel",)
    # once the real batch is large enough to split across the two TensorCores.
    return out_p[:B, :output_dim]


# -------------- Parameter packing (PyTorch layout -> lane-slab kernel layout) --------------
def pack_params(params, hidden_dim):
    H = hidden_dim
    Hp = _round_up(H, LANE)
    O = params["b_fc"].shape[0]
    Op = _round_up(O, LANE)

    def in_slab(w_rows):            # (H, in) PyTorch row-block -> (in, Hp) transposed, lane-padded
        return jnp.pad(w_rows.T, ((0, 0), (0, Hp - H)))

    def hh_slab(w_rows):            # (H, H) -> (Hp, Hp): rows/cols beyond H are zero
        return jnp.pad(w_rows.T, ((0, Hp - H), (0, Hp - H)))

    def b_slab(b):                  # (H,) -> (Hp,)
        return jnp.pad(b, (0, Hp - H))

    def split3(w):
        return w[0:H], w[H:2 * H], w[2 * H:3 * H]

    wif_r, wif_z, wif_n = split3(params["w_ih_fwd"])
    wib_r, wib_z, wib_n = split3(params["w_ih_bwd"])
    whf_r, whf_z, whf_n = split3(params["w_hh_fwd"])

    # One (E, 6*Hp) input-projection matrix: [fwd_r | fwd_z | fwd_n | bwd_r | bwd_z | bwd_n]
    w_in = jnp.concatenate([in_slab(wif_r), in_slab(wif_z), in_slab(wif_n),
                            in_slab(wib_r), in_slab(wib_z), in_slab(wib_n)], axis=1)

    bif, bhf = params["b_ih_fwd"], params["b_hh_fwd"]
    bib, bhb = params["b_ih_bwd"], params["b_hh_bwd"]
    # r/z biases pre-folded (b_ih + b_hh); n keeps only b_ih here, b_hh_n stays separate.
    b_in = jnp.concatenate([
        b_slab(bif[0:H] + bhf[0:H]), b_slab(bif[H:2 * H] + bhf[H:2 * H]), b_slab(bif[2 * H:]),
        b_slab(bib[0:H] + bhb[0:H]), b_slab(bib[H:2 * H] + bhb[H:2 * H]), b_slab(bib[2 * H:]),
    ]).reshape(1, 6 * Hp)

    # One (Hp, 3*Hp) recurrent matrix (forward only; backward W_hh never used at output[-1]).
    w_hh = jnp.concatenate([hh_slab(whf_r), hh_slab(whf_z), hh_slab(whf_n)], axis=1)

    w_fc = params["w_fc"]           # (O, 2H)
    wfc_f = jnp.pad(w_fc[:, :H].T, ((0, Hp - H), (0, Op - O)))   # (Hp, Op)
    wfc_b = jnp.pad(w_fc[:, H:].T, ((0, Hp - H), (0, Op - O)))

    bf16 = jnp.bfloat16
    return {
        "embedding": params["embedding"].astype(bf16),
        "w_in": w_in.astype(bf16),
        "b_in": b_in.astype(jnp.float32),
        "w_hh": w_hh.astype(bf16),
        "b_hn_fwd": b_slab(bhf[2 * H:]).reshape(1, Hp).astype(jnp.float32),
        "b_hn_bwd": b_slab(bhb[2 * H:]).reshape(1, Hp).astype(jnp.float32),
        "w_fc": jnp.stack([wfc_f, wfc_b]).astype(bf16),          # (2, Hp, Op)
        "b_fc": jnp.pad(params["b_fc"], (0, Op - O)).reshape(1, Op).astype(jnp.float32),
    }


# -------------- Pure-JAX f32 reference (full bidirectional GRU) --------------
def gru_cell_ref(h, x, w_ih, w_hh, b_ih, b_hh):
    H = h.shape[-1]
    gi = x @ w_ih.T + b_ih
    gh = h @ w_hh.T + b_hh
    r = jax.nn.sigmoid(gi[:, :H] + gh[:, :H])
    z = jax.nn.sigmoid(gi[:, H:2 * H] + gh[:, H:2 * H])
    n = jnp.tanh(gi[:, 2 * H:] + r * gh[:, 2 * H:])
    return (1.0 - z) * n + z * h


def reference_forward(text, params):
    emb = jnp.take(params["embedding"], text, axis=0)     # (L, B, E)
    L, B, _ = emb.shape
    H = params["w_hh_fwd"].shape[1]

    h = jnp.zeros((B, H), jnp.float32)
    fwd_out = []
    for t in range(L):
        h = gru_cell_ref(h, emb[t], params["w_ih_fwd"], params["w_hh_fwd"],
                         params["b_ih_fwd"], params["b_hh_fwd"])
        fwd_out.append(h)

    hb = jnp.zeros((B, H), jnp.float32)
    bwd_out = [None] * L
    for t in range(L - 1, -1, -1):
        hb = gru_cell_ref(hb, emb[t], params["w_ih_bwd"], params["w_hh_bwd"],
                          params["b_ih_bwd"], params["b_hh_bwd"])
        bwd_out[t] = hb

    out_last = jnp.concatenate([fwd_out[-1], bwd_out[-1]], axis=-1)   # output[-1], (B, 2H)
    return out_last @ params["w_fc"].T + params["b_fc"]


# -------------- Deterministic parameter init (PyTorch-like shapes) --------------
def make_params(key, input_dim, embedding_dim, hidden_dim, output_dim):
    ks = jax.random.split(key, 12)
    E, H, O = embedding_dim, hidden_dim, output_dim
    s = 1.0 / jnp.sqrt(H)

    def u(k, shape):
        return jax.random.uniform(k, shape, jnp.float32, -s, s)

    return {
        "embedding": jax.random.normal(ks[0], (input_dim, E), jnp.float32),
        "w_ih_fwd": u(ks[1], (3 * H, E)),
        "w_hh_fwd": u(ks[2], (3 * H, H)),
        "b_ih_fwd": u(ks[3], (3 * H,)),
        "b_hh_fwd": u(ks[4], (3 * H,)),
        "w_ih_bwd": u(ks[5], (3 * H, E)),
        "w_hh_bwd": u(ks[6], (3 * H, H)),
        "b_ih_bwd": u(ks[7], (3 * H,)),
        "b_hh_bwd": u(ks[8], (3 * H,)),
        "w_fc": u(ks[9], (O, 2 * H)),
        "b_fc": u(ks[10], (O,)),
    }


if __name__ == "__main__":
    input_dim = 64      # vocab size
    embedding_dim = 32
    hidden_dim = 32
    output_dim = 8
    seq_len = 8
    batch = 4

    key = jax.random.PRNGKey(0)
    k_par, k_txt = jax.random.split(key)
    params = make_params(k_par, input_dim, embedding_dim, hidden_dim, output_dim)
    packed = pack_params(params, hidden_dim)
    text = jax.random.randint(k_txt, (seq_len, batch), 0, input_dim, dtype=jnp.int32)

    forward = jax.jit(bigru_dropout_forward, static_argnums=(2,))
    out = jax.block_until_ready(forward(text, packed, output_dim))

    ref = reference_forward(text, params)
    assert out.shape == (batch, output_dim)
    # bf16 MXU operands with f32 accumulation -> relaxed tolerance vs. the f32 reference.
    assert jnp.allclose(out, ref, atol=5e-2, rtol=5e-2), (
        f"max abs err {jnp.max(jnp.abs(out - ref))}")

    print("KERNEL_OK")
</pallas_src>

<mosaic_0001>
module attributes {stable_mosaic.version = 11 : i64} {
  func.func @bigru_fused_kernel(%arg0: memref<64x1xi32, #tpu.memory_space<vmem>>, %arg1: memref<64x32xbf16, #tpu.memory_space<vmem>>, %arg2: memref<32x768xbf16, #tpu.memory_space<vmem>>, %arg3: memref<1x768xf32, #tpu.memory_space<vmem>>, %arg4: memref<128x384xbf16, #tpu.memory_space<vmem>>, %arg5: memref<1x128xf32, #tpu.memory_space<vmem>>, %arg6: memref<1x128xf32, #tpu.memory_space<vmem>>, %arg7: memref<2x128x128xbf16, #tpu.memory_space<vmem>>, %arg8: memref<1x128xf32, #tpu.memory_space<vmem>>, %arg9: memref<8x128xf32, #tpu.memory_space<vmem>>) attributes {dimension_semantics = [], scalar_prefetch = 0 : i64, scratch_operands = 0 : i64, tpu.core_type = #tpu.core_type<tc>} {
    %c0 = arith.constant 0 : index
    %c0_0 = arith.constant 0 : index
    %0 = vector.load %arg0[%c0, %c0_0] : memref<64x1xi32, #tpu.memory_space<vmem>>, vector<64x1xi32>
    %1 = tpu.iota {dimensions = array<i32: 1>} : vector<64x64xi32>
    %2 = vector.broadcast %0 : vector<64x1xi32> to vector<64x64xi32>
    %3 = arith.cmpi eq, %2, %1 : vector<64x64xi32>
    %4 = arith.extui %3 : vector<64x64xi1> to vector<64x64xi32>
    %5 = arith.sitofp %4 : vector<64x64xi32> to vector<64x64xf32>
    %6 = arith.truncf %5 : vector<64x64xf32> to vector<64x64xbf16>
    %c0_1 = arith.constant 0 : index
    %c0_2 = arith.constant 0 : index
    %7 = vector.load %arg1[%c0_1, %c0_2] : memref<64x32xbf16, #tpu.memory_space<vmem>>, vector<64x32xbf16>
    %cst = arith.constant dense<0.000000e+00> : vector<64x32xf32>
    %8 = tpu.matmul %6, %7, %cst {dimension_numbers = #tpu.dot_dimension_numbers<[1], [0], [0], [1], [0, 0, 1, 1], [], []>} : vector<64x64xbf16>, vector<64x32xbf16>, vector<64x32xf32> -> vector<64x32xf32>
    %9 = arith.truncf %8 : vector<64x32xf32> to vector<64x32xbf16>
    %c0_3 = arith.constant 0 : index
    %c0_4 = arith.constant 0 : index
    %10 = vector.load %arg2[%c0_3, %c0_4] : memref<32x768xbf16, #tpu.memory_space<vmem>>, vector<32x768xbf16>
    %cst_5 = arith.constant dense<0.000000e+00> : vector<64x768xf32>
    %11 = tpu.matmul %9, %10, %cst_5 {dimension_numbers = #tpu.dot_dimension_numbers<[1], [0], [0], [1], [0, 0, 1, 1], [], []>} : vector<64x32xbf16>, vector<32x768xbf16>, vector<64x768xf32> -> vector<64x768xf32>
    %c0_6 = arith.constant 0 : index
    %c0_7 = arith.constant 0 : index
    %12 = vector.load %arg3[%c0_6, %c0_7] : memref<1x768xf32, #tpu.memory_space<vmem>>, vector<1x768xf32>
    %13 = vector.broadcast %12 : vector<1x768xf32> to vector<64x768xf32>
    %14 = arith.addf %11, %13 : vector<64x768xf32>
    %c0_8 = arith.constant 0 : index
    %c0_9 = arith.constant 0 : index
    %15 = vector.load %arg4[%c0_8, %c0_9] : memref<128x384xbf16, #tpu.memory_space<vmem>>, vector<128x384xbf16>
    %c0_10 = arith.constant 0 : index
    %c0_11 = arith.constant 0 : index
    %16 = vector.load %arg5[%c0_10, %c0_11] : memref<1x128xf32, #tpu.memory_space<vmem>>, vector<1x128xf32>
    %17 = vector.shape_cast %16 : vector<1x128xf32> to vector<1x128xf32>
    %18 = vector.broadcast %17 : vector<1x128xf32> to vector<8x128xf32>
    %cst_12 = arith.constant 0.000000e+00 : f32
    %19 = vector.broadcast %cst_12 : f32 to vector<8x128xf32>
    %20 = arith.truncf %19 : vector<8x128xf32> to vector<8x128xbf16>
    %cst_13 = arith.constant dense<0.000000e+00> : vector<8x384xf32>
    %21 = tpu.matmul %20, %15, %cst_13 {dimension_numbers = #tpu.dot_dimension_numbers<[1], [0], [0], [1], [0, 0, 1, 1], [], []>} : vector<8x128xbf16>, vector<128x384xbf16>, vector<8x384xf32> -> vector<8x384xf32>
    %22 = vector.extract_strided_slice %14 {offsets = [0, 0], sizes = [8, 128], strides = [1, 1]} : vector<64x768xf32> to vector<8x128xf32>
    %23 = vector.extract_strided_slice %21 {offsets = [0, 0], sizes = [8, 128], strides = [1, 1]} : vector<8x384xf32> to vector<8x128xf32>
    %24 = arith.addf %22, %23 : vector<8x128xf32>
    %25 = arith.negf %24 : vector<8x128xf32>
    %26 = math.exp %25 : vector<8x128xf32>
    %cst_14 = arith.constant 1.000000e+00 : f32
    %27 = vector.broadcast %cst_14 : f32 to vector<8x128xf32>
    %28 = arith.addf %27, %26 : vector<8x128xf32>
    %29 = arith.divf %27, %28 : vector<8x128xf32>
    %30 = vector.extract_strided_slice %14 {offsets = [0, 128], sizes = [8, 128], strides = [1, 1]} : vector<64x768xf32> to vector<8x128xf32>
    %31 = vector.extract_strided_slice %21 {offsets = [0, 128], sizes = [8, 128], strides = [1, 1]} : vector<8x384xf32> to vector<8x128xf32>
    %32 = arith.addf %30, %31 : vector<8x128xf32>
    %33 = arith.negf %32 : vector<8x128xf32>
    %34 = math.exp %33 : vector<8x128xf32>
    %cst_15 = arith.constant 1.000000e+00 : f32
    %35 = vector.broadcast %cst_15 : f32 to vector<8x128xf32>
    %36 = arith.addf %35, %34 : vector<8x128xf32>
    %37 = arith.divf %35, %36 : vector<8x128xf32>
    %38 = vector.extract_strided_slice %14 {offsets = [0, 256], sizes = [8, 128], strides = [1, 1]} : vector<64x768xf32> to vector<8x128xf32>
    %39 = vector.extract_strided_slice %21 {offsets = [0, 256], sizes = [8, 128], strides = [1, 1]} : vector<8x384xf32> to vector<8x128xf32>
    %40 = arith.addf %39, %18 : vector<8x128xf32>
    %41 = arith.mulf %29, %40 : vector<8x128xf32>
    %42 = arith.addf %38, %41 : vector<8x128xf32>
    %43 = math.tanh %42 : vector<8x128xf32>
    %cst_16 = arith.constant 1.000000e+00 : f32
    %44 = vector.broadcast %cst_16 : f32 to vector<8x128xf32>
    %45 = arith.subf %44, %37 : vector<8x128xf32>
    %46 = arith.mulf %45, %43 : vector<8x128xf32>
    %47 = arith.mulf %37, %19 : vector<8x128xf32>
    %48 = arith.addf %46, %47 : vector<8x128xf32>
    %49 = arith.truncf %48 : vector<8x128xf32> to vector<8x128xbf16>
    %cst_17 = arith.constant dense<0.000000e+00> : vector<8x384xf32>
    %50 = tpu.matmul %49, %15, %cst_17 {dimension_numbers = #tpu.dot_dimension_numbers<[1], [0], [0], [1], [0, 0, 1, 1], [], []>} : vector<8x128xbf16>, vector<128x384xbf16>, vector<8x384xf32> -> vector<8x384xf32>
    %51 = vector.extract_strided_slice %14 {offsets = [8, 0], sizes = [8, 128], strides = [1, 1]} : vector<64x768xf32> to vector<8x128xf32>
    %52 = vector.extract_strided_slice %50 {offsets = [0, 0], sizes = [8, 128], strides = [1, 1]} : vector<8x384xf32> to vector<8x128xf32>
    %53 = arith.addf %51, %52 : vector<8x128xf32>
    %54 = arith.negf %53 : vector<8x128xf32>
    %55 = math.exp %54 : vector<8x128xf32>
    %cst_18 = arith.constant 1.000000e+00 : f32
    %56 = vector.broadcast %cst_18 : f32 to vector<8x128xf32>
    %57 = arith.addf %56, %55 : vector<8x128xf32>
    %58 = arith.divf %56, %57 : vector<8x128xf32>
    %59 = vector.extract_strided_slice %14 {offsets = [8, 128], sizes = [8, 128], strides = [1, 1]} : vector<64x768xf32> to vector<8x128xf32>
    %60 = vector.extract_strided_slice %50 {offsets = [0, 128], sizes = [8, 128], strides = [1, 1]} : vector<8x384xf32> to vector<8x128xf32>
    %61 = arith.addf %59, %60 : vector<8x128xf32>
    %62 = arith.negf %61 : vector<8x128xf32>
    %63 = math.exp %62 : vector<8x128xf32>
    %cst_19 = arith.constant 1.000000e+00 : f32
    %64 = vector.broadcast %cst_19 : f32 to vector<8x128xf32>
    %65 = arith.addf %64, %63 : vector<8x128xf32>
    %66 = arith.divf %64, %65 : vector<8x128xf32>
    %67 = vector.extract_strided_slice %14 {offsets = [8, 256], sizes = [8, 128], strides = [1, 1]} : vector<64x768xf32> to vector<8x128xf32>
    %68 = vector.extract_strided_slice %50 {offsets = [0, 256], sizes = [8, 128], strides = [1, 1]} : vector<8x384xf32> to vector<8x128xf32>
    %69 = arith.addf %68, %18 : vector<8x128xf32>
    %70 = arith.mulf %58, %69 : vector<8x128xf32>
    %71 = arith.addf %67, %70 : vector<8x128xf32>
    %72 = math.tanh %71 : vector<8x128xf32>
    %cst_20 = arith.constant 1.000000e+00 : f32
    %73 = vector.broadcast %cst_20 : f32 to vector<8x128xf32>
    %74 = arith.subf %73, %66 : vector<8x128xf32>
    %75 = arith.mulf %74, %72 : vector<8x128xf32>
    %76 = arith.mulf %66, %48 : vector<8x128xf32>
    %77 = arith.addf %75, %76 : vector<8x128xf32>
    %78 = arith.truncf %77 : vector<8x128xf32> to vector<8x128xbf16>
    %cst_21 = arith.constant dense<0.000000e+00> : vector<8x384xf32>
    %79 = tpu.matmul %78, %15, %cst_21 {dimension_numbers = #tpu.dot_dimension_numbers<[1], [0], [0], [1], [0, 0, 1, 1], [], []>} : vector<8x128xbf16>, vector<128x384xbf16>, vector<8x384xf32> -> vector<8x384xf32>
    %80 = vector.extract_strided_slice %14 {offsets = [16, 0], sizes = [8, 128], strides = [1, 1]} : vector<64x768xf32> to vector<8x128xf32>
    %81 = vector.extract_strided_slice %79 {offsets = [0, 0], sizes = [8, 128], strides = [1, 1]} : vector<8x384xf32> to vector<8x128xf32>
    %82 = arith.addf %80, %81 : vector<8x128xf32>
    %83 = arith.negf %82 : vector<8x128xf32>
    %84 = math.exp %83 : vector<8x128xf32>
    %cst_22 = arith.constant 1.000000e+00 : f32
    %85 = vector.broadcast %cst_22 : f32 to vector<8x128xf32>
    %86 = arith.addf %85, %84 : vector<8x128xf32>
    %87 = arith.divf %85, %86 : vector<8x128xf32>
    %88 = vector.extract_strided_slice %14 {offsets = [16, 128], sizes = [8, 128], strides = [1, 1]} : vector<64x768xf32> to vector<8x128xf32>
    %89 = vector.extract_strided_slice %79 {offsets = [0, 128], sizes = [8, 128], strides = [1, 1]} : vector<8x384xf32> to vector<8x128xf32>
    %90 = arith.addf %88, %89 : vector<8x128xf32>
    %91 = arith.negf %90 : vector<8x128xf32>
    %92 = math.exp %91 : vector<8x128xf32>
    %cst_23 = arith.constant 1.000000e+00 : f32
    %93 = vector.broadcast %cst_23 : f32 to vector<8x128xf32>
    %94 = arith.addf %93, %92 : vector<8x128xf32>
    %95 = arith.divf %93, %94 : vector<8x128xf32>
    %96 = vector.extract_strided_slice %14 {offsets = [16, 256], sizes = [8, 128], strides = [1, 1]} : vector<64x768xf32> to vector<8x128xf32>
    %97 = vector.extract_strided_slice %79 {offsets = [0, 256], sizes = [8, 128], strides = [1, 1]} : vector<8x384xf32> to vector<8x128xf32>
    %98 = arith.addf %97, %18 : vector<8x128xf32>
    %99 = arith.mulf %87, %98 : vector<8x128xf32>
    %100 = arith.addf %96, %99 : vector<8x128xf32>
    %101 = math.tanh %100 : vector<8x128xf32>
    %cst_24 = arith.constant 1.000000e+00 : f32
    %102 = vector.broadcast %cst_24 : f32 to vector<8x128xf32>
    %103 = arith.subf %102, %95 : vector<8x128xf32>
    %104 = arith.mulf %103, %101 : vector<8x128xf32>
    %105 = arith.mulf %95, %77 : vector<8x128xf32>
    %106 = arith.addf %104, %105 : vector<8x128xf32>
    %107 = arith.truncf %106 : vector<8x128xf32> to vector<8x128xbf16>
    %cst_25 = arith.constant dense<0.000000e+00> : vector<8x384xf32>
    %108 = tpu.matmul %107, %15, %cst_25 {dimension_numbers = #tpu.dot_dimension_numbers<[1], [0], [0], [1], [0, 0, 1, 1], [], []>} : vector<8x128xbf16>, vector<128x384xbf16>, vector<8x384xf32> -> vector<8x384xf32>
    %109 = vector.extract_strided_slice %14 {offsets = [24, 0], sizes = [8, 128], strides = [1, 1]} : vector<64x768xf32> to vector<8x128xf32>
    %110 = vector.extract_strided_slice %108 {offsets = [0, 0], sizes = [8, 128], strides = [1, 1]} : vector<8x384xf32> to vector<8x128xf32>
    %111 = arith.addf %109, %110 : vector<8x128xf32>
    %112 = arith.negf %111 : vector<8x128xf32>
    %113 = math.exp %112 : vector<8x128xf32>
    %cst_26 = arith.constant 1.000000e+00 : f32
    %114 = vector.broadcast %cst_26 : f32 to vector<8x128xf32>
    %115 = arith.addf %114, %113 : vector<8x128xf32>
    %116 = arith.divf %114, %115 : vector<8x128xf32>
    %117 = vector.extract_strided_slice %14 {offsets = [24, 128], sizes = [8, 128], strides = [1, 1]} : vector<64x768xf32> to vector<8x128xf32>
    %118 = vector.extract_strided_slice %108 {offsets = [0, 128], sizes = [8, 128], strides = [1, 1]} : vector<8x384xf32> to vector<8x128xf32>
    %119 = arith.addf %117, %118 : vector<8x128xf32>
    %120 = arith.negf %119 : vector<8x128xf32>
    %121 = math.exp %120 : vector<8x128xf32>
    %cst_27 = arith.constant 1.000000e+00 : f32
    %122 = vector.broadcast %cst_27 : f32 to vector<8x128xf32>
    %123 = arith.addf %122, %121 : vector<8x128xf32>
    %124 = arith.divf %122, %123 : vector<8x128xf32>
    %125 = vector.extract_strided_slice %14 {offsets = [24, 256], sizes = [8, 128], strides = [1, 1]} : vector<64x768xf32> to vector<8x128xf32>
    %126 = vector.extract_strided_slice %108 {offsets = [0, 256], sizes = [8, 128], strides = [1, 1]} : vector<8x384xf32> to vector<8x128xf32>
    %127 = arith.addf %126, %18 : vector<8x128xf32>
    %128 = arith.mulf %116, %127 : vector<8x128xf32>
    %129 = arith.addf %125, %128 : vector<8x128xf32>
    %130 = math.tanh %129 : vector<8x128xf32>
    %cst_28 = arith.constant 1.000000e+00 : f32
    %131 = vector.broadcast %cst_28 : f32 to vector<8x128xf32>
    %132 = arith.subf %131, %124 : vector<8x128xf32>
    %133 = arith.mulf %132, %130 : vector<8x128xf32>
    %134 = arith.mulf %124, %106 : vector<8x128xf32>
    %135 = arith.addf %133, %134 : vector<8x128xf32>
    %136 = arith.truncf %135 : vector<8x128xf32> to vector<8x128xbf16>
    %cst_29 = arith.constant dense<0.000000e+00> : vector<8x384xf32>
    %137 = tpu.matmul %136, %15, %cst_29 {dimension_numbers = #tpu.dot_dimension_numbers<[1], [0], [0], [1], [0, 0, 1, 1], [], []>} : vector<8x128xbf16>, vector<128x384xbf16>, vector<8x384xf32> -> vector<8x384xf32>
    %138 = vector.extract_strided_slice %14 {offsets = [32, 0], sizes = [8, 128], strides = [1, 1]} : vector<64x768xf32> to vector<8x128xf32>
    %139 = vector.extract_strided_slice %137 {offsets = [0, 0], sizes = [8, 128], strides = [1, 1]} : vector<8x384xf32> to vector<8x128xf32>
    %140 = arith.addf %138, %139 : vector<8x128xf32>
    %141 = arith.negf %140 : vector<8x128xf32>
    %142 = math.exp %141 : vector<8x128xf32>
    %cst_30 = arith.constant 1.000000e+00 : f32
    %143 = vector.broadcast %cst_30 : f32 to vector<8x128xf32>
    %144 = arith.addf %143, %142 : vector<8x128xf32>
    %145 = arith.divf %143, %144 : vector<8x128xf32>
    %146 = vector.extract_strided_slice %14 {offsets = [32, 128], sizes = [8, 128], strides = [1, 1]} : vector<64x768xf32> to vector<8x128xf32>
    %147 = vector.extract_strided_slice %137 {offsets = [0, 128], sizes = [8, 128], strides = [1, 1]} : vector<8x384xf32> to vector<8x128xf32>
    %148 = arith.addf %146, %147 : vector<8x128xf32>
    %149 = arith.negf %148 : vector<8x128xf32>
    %150 = math.exp %149 : vector<8x128xf32>
    %cst_31 = arith.constant 1.000000e+00 : f32
    %151 = vector.broadcast %cst_31 : f32 to vector<8x128xf32>
    %152 = arith.addf %151, %150 : vector<8x128xf32>
    %153 = arith.divf %151, %152 : vector<8x128xf32>
    %154 = vector.extract_strided_slice %14 {offsets = [32, 256], sizes = [8, 128], strides = [1, 1]} : vector<64x768xf32> to vector<8x128xf32>
    %155 = vector.extract_strided_slice %137 {offsets = [0, 256], sizes = [8, 128], strides = [1, 1]} : vector<8x384xf32> to vector<8x128xf32>
    %156 = arith.addf %155, %18 : vector<8x128xf32>
    %157 = arith.mulf %145, %156 : vector<8x128xf32>
    %158 = arith.addf %154, %157 : vector<8x128xf32>
    %159 = math.tanh %158 : vector<8x128xf32>
    %cst_32 = arith.constant 1.000000e+00 : f32
    %160 = vector.broadcast %cst_32 : f32 to vector<8x128xf32>
    %161 = arith.subf %160, %153 : vector<8x128xf32>
    %162 = arith.mulf %161, %159 : vector<8x128xf32>
    %163 = arith.mulf %153, %135 : vector<8x128xf32>
    %164 = arith.addf %162, %163 : vector<8x128xf32>
    %165 = arith.truncf %164 : vector<8x128xf32> to vector<8x128xbf16>
    %cst_33 = arith.constant dense<0.000000e+00> : vector<8x384xf32>
    %166 = tpu.matmul %165, %15, %cst_33 {dimension_numbers = #tpu.dot_dimension_numbers<[1], [0], [0], [1], [0, 0, 1, 1], [], []>} : vector<8x128xbf16>, vector<128x384xbf16>, vector<8x384xf32> -> vector<8x384xf32>
    %167 = vector.extract_strided_slice %14 {offsets = [40, 0], sizes = [8, 128], strides = [1, 1]} : vector<64x768xf32> to vector<8x128xf32>
    %168 = vector.extract_strided_slice %166 {offsets = [0, 0], sizes = [8, 128], strides = [1, 1]} : vector<8x384xf32> to vector<8x128xf32>
    %169 = arith.addf %167, %168 : vector<8x128xf32>
    %170 = arith.negf %169 : vector<8x128xf32>
    %171 = math.exp %170 : vector<8x128xf32>
    %cst_34 = arith.constant 1.000000e+00 : f32
    %172 = vector.broadcast %cst_34 : f32 to vector<8x128xf32>
    %173 = arith.addf %172, %171 : vector<8x128xf32>
    %174 = arith.divf %172, %173 : vector<8x128xf32>
    %175 = vector.extract_strided_slice %14 {offsets = [40, 128], sizes = [8, 128], strides = [1, 1]} : vector<64x768xf32> to vector<8x128xf32>
    %176 = vector.extract_strided_slice %166 {offsets = [0, 128], sizes = [8, 128], strides = [1, 1]} : vector<8x384xf32> to vector<8x128xf32>
    %177 = arith.addf %175, %176 : vector<8x128xf32>
    %178 = arith.negf %177 : vector<8x128xf32>
    %179 = math.exp %178 : vector<8x128xf32>
    %cst_35 = arith.constant 1.000000e+00 : f32
    %180 = vector.broadcast %cst_35 : f32 to vector<8x128xf32>
    %181 = arith.addf %180, %179 : vector<8x128xf32>
    %182 = arith.divf %180, %181 : vector<8x128xf32>
    %183 = vector.extract_strided_slice %14 {offsets = [40, 256], sizes = [8, 128], strides = [1, 1]} : vector<64x768xf32> to vector<8x128xf32>
    %184 = vector.extract_strided_slice %166 {offsets = [0, 256], sizes = [8, 128], strides = [1, 1]} : vector<8x384xf32> to vector<8x128xf32>
    %185 = arith.addf %184, %18 : vector<8x128xf32>
    %186 = arith.mulf %174, %185 : vector<8x128xf32>
    %187 = arith.addf %183, %186 : vector<8x128xf32>
    %188 = math.tanh %187 : vector<8x128xf32>
    %cst_36 = arith.constant 1.000000e+00 : f32
    %189 = vector.broadcast %cst_36 : f32 to vector<8x128xf32>
    %190 = arith.subf %189, %182 : vector<8x128xf32>
    %191 = arith.mulf %190, %188 : vector<8x128xf32>
    %192 = arith.mulf %182, %164 : vector<8x128xf32>
    %193 = arith.addf %191, %192 : vector<8x128xf32>
    %194 = arith.truncf %193 : vector<8x128xf32> to vector<8x128xbf16>
    %cst_37 = arith.constant dense<0.000000e+00> : vector<8x384xf32>
    %195 = tpu.matmul %194, %15, %cst_37 {dimension_numbers = #tpu.dot_dimension_numbers<[1], [0], [0], [1], [0, 0, 1, 1], [], []>} : vector<8x128xbf16>, vector<128x384xbf16>, vector<8x384xf32> -> vector<8x384xf32>
    %196 = vector.extract_strided_slice %14 {offsets = [48, 0], sizes = [8, 128], strides = [1, 1]} : vector<64x768xf32> to vector<8x128xf32>
    %197 = vector.extract_strided_slice %195 {offsets = [0, 0], sizes = [8, 128], strides = [1, 1]} : vector<8x384xf32> to vector<8x128xf32>
    %198 = arith.addf %196, %197 : vector<8x128xf32>
    %199 = arith.negf %198 : vector<8x128xf32>
    %200 = math.exp %199 : vector<8x128xf32>
    %cst_38 = arith.constant 1.000000e+00 : f32
    %201 = vector.broadcast %cst_38 : f32 to vector<8x128xf32>
    %202 = arith.addf %201, %200 : vector<8x128xf32>
    %203 = arith.divf %201, %202 : vector<8x128xf32>
    %204 = vector.extract_strided_slice %14 {offsets = [48, 128], sizes = [8, 128], strides = [1, 1]} : vector<64x768xf32> to vector<8x128xf32>
    %205 = vector.extract_strided_slice %195 {offsets = [0, 128], sizes = [8, 128], strides = [1, 1]} : vector<8x384xf32> to vector<8x128xf32>
    %206 = arith.addf %204, %205 : vector<8x128xf32>
    %207 = arith.negf %206 : vector<8x128xf32>
    %208 = math.exp %207 : vector<8x128xf32>
    %cst_39 = arith.constant 1.000000e+00 : f32
    %209 = vector.broadcast %cst_39 : f32 to vector<8x128xf32>
    %210 = arith.addf %209, %208 : vector<8x128xf32>
    %211 = arith.divf %209, %210 : vector<8x128xf32>
    %212 = vector.extract_strided_slice %14 {offsets = [48, 256], sizes = [8, 128], strides = [1, 1]} : vector<64x768xf32> to vector<8x128xf32>
    %213 = vector.extract_strided_slice %195 {offsets = [0, 256], sizes = [8, 128], strides = [1, 1]} : vector<8x384xf32> to vector<8x128xf32>
    %214 = arith.addf %213, %18 : vector<8x128xf32>
    %215 = arith.mulf %203, %214 : vector<8x128xf32>
    %216 = arith.addf %212, %215 : vector<8x128xf32>
    %217 = math.tanh %216 : vector<8x128xf32>
    %cst_40 = arith.constant 1.000000e+00 : f32
    %218 = vector.broadcast %cst_40 : f32 to vector<8x128xf32>
    %219 = arith.subf %218, %211 : vector<8x128xf32>
    %220 = arith.mulf %219, %217 : vector<8x128xf32>
    %221 = arith.mulf %211, %193 : vector<8x128xf32>
    %222 = arith.addf %220, %221 : vector<8x128xf32>
    %223 = arith.truncf %222 : vector<8x128xf32> to vector<8x128xbf16>
    %cst_41 = arith.constant dense<0.000000e+00> : vector<8x384xf32>
    %224 = tpu.matmul %223, %15, %cst_41 {dimension_numbers = #tpu.dot_dimension_numbers<[1], [0], [0], [1], [0, 0, 1, 1], [], []>} : vector<8x128xbf16>, vector<128x384xbf16>, vector<8x384xf32> -> vector<8x384xf32>
    %225 = vector.extract_strided_slice %14 {offsets = [56, 0], sizes = [8, 128], strides = [1, 1]} : vector<64x768xf32> to vector<8x128xf32>
    %226 = vector.extract_strided_slice %224 {offsets = [0, 0], sizes = [8, 128], strides = [1, 1]} : vector<8x384xf32> to vector<8x128xf32>
    %227 = arith.addf %225, %226 : vector<8x128xf32>
    %228 = arith.negf %227 : vector<8x128xf32>
    %229 = math.exp %228 : vector<8x128xf32>
    %cst_42 = arith.constant 1.000000e+00 : f32
    %230 = vector.broadcast %cst_42 : f32 to vector<8x128xf32>
    %231 = arith.addf %230, %229 : vector<8x128xf32>
    %232 = arith.divf %230, %231 : vector<8x128xf32>
    %233 = vector.extract_strided_slice %14 {offsets = [56, 128], sizes = [8, 128], strides = [1, 1]} : vector<64x768xf32> to vector<8x128xf32>
    %234 = vector.extract_strided_slice %224 {offsets = [0, 128], sizes = [8, 128], strides = [1, 1]} : vector<8x384xf32> to vector<8x128xf32>
    %235 = arith.addf %233, %234 : vector<8x128xf32>
    %236 = arith.negf %235 : vector<8x128xf32>
    %237 = math.exp %236 : vector<8x128xf32>
    %cst_43 = arith.constant 1.000000e+00 : f32
    %238 = vector.broadcast %cst_43 : f32 to vector<8x128xf32>
    %239 = arith.addf %238, %237 : vector<8x128xf32>
    %240 = arith.divf %238, %239 : vector<8x128xf32>
    %241 = vector.extract_strided_slice %14 {offsets = [56, 256], sizes = [8, 128], strides = [1, 1]} : vector<64x768xf32> to vector<8x128xf32>
    %242 = vector.extract_strided_slice %224 {offsets = [0, 256], sizes = [8, 128], strides = [1, 1]} : vector<8x384xf32> to vector<8x128xf32>
    %243 = arith.addf %242, %18 : vector<8x128xf32>
    %244 = arith.mulf %232, %243 : vector<8x128xf32>
    %245 = arith.addf %241, %244 : vector<8x128xf32>
    %246 = math.tanh %245 : vector<8x128xf32>
    %cst_44 = arith.constant 1.000000e+00 : f32
    %247 = vector.broadcast %cst_44 : f32 to vector<8x128xf32>
    %248 = arith.subf %247, %240 : vector<8x128xf32>
    %249 = arith.mulf %248, %246 : vector<8x128xf32>
    %250 = arith.mulf %240, %222 : vector<8x128xf32>
    %251 = arith.addf %249, %250 : vector<8x128xf32>
    %252 = vector.extract_strided_slice %14 {offsets = [56, 384], sizes = [8, 128], strides = [1, 1]} : vector<64x768xf32> to vector<8x128xf32>
    %253 = arith.negf %252 : vector<8x128xf32>
    %254 = math.exp %253 : vector<8x128xf32>
    %cst_45 = arith.constant 1.000000e+00 : f32
    %255 = vector.broadcast %cst_45 : f32 to vector<8x128xf32>
    %256 = arith.addf %255, %254 : vector<8x128xf32>
    %257 = arith.divf %255, %256 : vector<8x128xf32>
    %258 = vector.extract_strided_slice %14 {offsets = [56, 512], sizes = [8, 128], strides = [1, 1]} : vector<64x768xf32> to vector<8x128xf32>
    %259 = arith.negf %258 : vector<8x128xf32>
    %260 = math.exp %259 : vector<8x128xf32>
    %cst_46 = arith.constant 1.000000e+00 : f32
    %261 = vector.broadcast %cst_46 : f32 to vector<8x128xf32>
    %262 = arith.addf %261, %260 : vector<8x128xf32>
    %263 = arith.divf %261, %262 : vector<8x128xf32>
    %264 = vector.extract_strided_slice %14 {offsets = [56, 640], sizes = [8, 128], strides = [1, 1]} : vector<64x768xf32> to vector<8x128xf32>
    %c0_47 = arith.constant 0 : index
    %c0_48 = arith.constant 0 : index
    %265 = vector.load %arg6[%c0_47, %c0_48] : memref<1x128xf32, #tpu.memory_space<vmem>>, vector<1x128xf32>
    %266 = vector.shape_cast %265 : vector<1x128xf32> to vector<1x128xf32>
    %267 = vector.broadcast %266 : vector<1x128xf32> to vector<8x128xf32>
    %268 = arith.mulf %257, %267 : vector<8x128xf32>
    %269 = arith.addf %264, %268 : vector<8x128xf32>
    %270 = math.tanh %269 : vector<8x128xf32>
    %cst_49 = arith.constant 1.000000e+00 : f32
    %271 = vector.broadcast %cst_49 : f32 to vector<8x128xf32>
    %272 = arith.subf %271, %263 : vector<8x128xf32>
    %273 = arith.mulf %272, %270 : vector<8x128xf32>
    %274 = arith.truncf %251 : vector<8x128xf32> to vector<8x128xbf16>
    %c0_50 = arith.constant 0 : index
    %c0_51 = arith.constant 0 : index
    %c0_52 = arith.constant 0 : index
    %275 = vector.load %arg7[%c0_50, %c0_51, %c0_52] : memref<2x128x128xbf16, #tpu.memory_space<vmem>>, vector<1x128x128xbf16>
    %276 = vector.shape_cast %275 : vector<1x128x128xbf16> to vector<128x128xbf16>
    %cst_53 = arith.constant dense<0.000000e+00> : vector<8x128xf32>
    %277 = tpu.matmul %274, %276, %cst_53 {dimension_numbers = #tpu.dot_dimension_numbers<[1], [0], [0], [1], [0, 0, 1, 1], [], []>} : vector<8x128xbf16>, vector<128x128xbf16>, vector<8x128xf32> -> vector<8x128xf32>
    %278 = arith.truncf %273 : vector<8x128xf32> to vector<8x128xbf16>
    %c1 = arith.constant 1 : index
    %c0_54 = arith.constant 0 : index
    %c0_55 = arith.constant 0 : index
    %279 = vector.load %arg7[%c1, %c0_54, %c0_55] : memref<2x128x128xbf16, #tpu.memory_space<vmem>>, vector<1x128x128xbf16>
    %280 = vector.shape_cast %279 : vector<1x128x128xbf16> to vector<128x128xbf16>
    %cst_56 = arith.constant dense<0.000000e+00> : vector<8x128xf32>
    %281 = tpu.matmul %278, %280, %cst_56 {dimension_numbers = #tpu.dot_dimension_numbers<[1], [0], [0], [1], [0, 0, 1, 1], [], []>} : vector<8x128xbf16>, vector<128x128xbf16>, vector<8x128xf32> -> vector<8x128xf32>
    %282 = arith.addf %277, %281 : vector<8x128xf32>
    %c0_57 = arith.constant 0 : index
    %c0_58 = arith.constant 0 : index
    %283 = vector.load %arg8[%c0_57, %c0_58] : memref<1x128xf32, #tpu.memory_space<vmem>>, vector<1x128xf32>
    %284 = vector.broadcast %283 : vector<1x128xf32> to vector<8x128xf32>
    %285 = arith.addf %282, %284 : vector<8x128xf32>
    %c0_59 = arith.constant 0 : index
    %c0_60 = arith.constant 0 : index
    %286 = vector.load %arg9[%c0_59, %c0_60] : memref<8x128xf32, #tpu.memory_space<vmem>>, vector<8x128xf32>
    tpu.vector_store %arg9[%c0_59, %c0_60], %285 {strides = array<i32>} : memref<8x128xf32, #tpu.memory_space<vmem>>, vector<8x128xf32>,
    return
  }
}

</mosaic_0001>

<bundles_post_ra>
// kernel: bigru_dropout_forward.1
= control target key start
LH: loop header
LB: loop body
LE: loop exit
PB: predicated region body
PF: predicated region fallthrough
CT: control target
= control target key end

     0   :  { %14 = vsyncpa [#allocation3], 0  ;;  %s3226_s0 = inlined_call_operand.vmem [shape: s32[64,1], index: 0, kind: input, shape index: {}]   ;;  %s3227_s1 = inlined_call_operand.vmem [shape: bf16[64,32], index: 1, kind: input, shape index: {}]   ;;  %s3228_s2 = inlined_call_operand.hbm [shape: bf16[32,768], index: 2, kind: input, shape index: {}]   ;;  %s3229_s3 = inlined_call_operand.vmem [shape: f32[1,768], index: 3, kind: input, shape index: {}]   ;;  %s3230_s4 = inlined_call_operand.hbm [shape: bf16[128,384], index: 4, kind: input, shape index: {}]   ;;  %s3231_s5 = inlined_call_operand.vmem [shape: f32[1,128], index: 5, kind: input, shape index: {}]   ;;  %s3232_s6 = inlined_call_operand.vmem [shape: f32[1,128], index: 6, kind: input, shape index: {}]   ;;  %s3233_s7 = inlined_call_operand.vmem [shape: bf16[2,128,128], index: 7, kind: input, shape index: {}]   ;;  %s3234_s8 = inlined_call_operand.vmem [shape: f32[1,128], index: 8, kind: input, shape index: {}]   ;;  %s3235_s9 = inlined_call_operand.vmem [shape: f32[8,128], index: 9, kind: output, shape index: {}]  }
   0x1   :  { %15 = vsyncpa [#allocation5], 0  ;;  %s2474_s30 = smov [#allocation2]   ;;  %s2426_s13 = scalar_lea.hbm %s3228_s2, 1536 }
   0x2   :  { %s25_s10 = sshll.u32 %s2474_s30, 4  ;;  %p2427_p0 = scmp.ne.s32.totalorder %s3228_s2, %s2426_s13  ;;  %s26_s10 = int_to_ptr.vmem [resolvable:$true] %s25_s10 }
   0x3   :  { %p2430_p1 = scmp.lt.u32.totalorder %s2426_s13, %s3228_s2 }
   0x5   :  { %p2432_p2 = pnand %p2430_p1, %p2427_p0 }
   0x7   :  { %2435 = shalt.err (!%p2432_p2)
}
   0x8   :  { %s2436_s18 = scalar_lea.vmem %s26_s10, 1536  ;;  %p2441_p4 = scmp.lt.s32.totalorder %s26_s10, %s26_s10 }
   0x9   :  { %p2437_p3 = scmp.ne.s32.totalorder %s26_s10, %s2436_s18  ;;  %p2442_p5 = scmp.lt.s32.totalorder %s2436_s18, %s2436_s18 }
   0xb   :  { %p2443_p6 = por %p2442_p5, %p2441_p4 }
   0xd   :  { %p2444_p7 = pnand %p2443_p6, %p2437_p3 }
   0xf   :  { %2447 = shalt.err (!%p2444_p7)
}
  0x10   :  { %s2475_s19 = smov 384   ;;  %s2476_s20 = smov 24  }
  0x11   :  { %31 = dma.hbm_to_vmem [thread:$0]  %s3228_s2, 1536, %s26_s10, [#allocation3], %s2475_s19, %s2475_s19, %s2476_s20  }
  0x12   :  { %s2477_s23 = smov [#allocation4]   ;;  %s2448_s27 = scalar_lea.hbm %s3230_s4, 3072 }
  0x13   :  { %s39_s24 = sshll.u32 %s2477_s23, 4  ;;  %p2449_p8 = scmp.ne.s32.totalorder %s3230_s4, %s2448_s27  ;;  %s40_s24 = int_to_ptr.vmem [resolvable:$true] %s39_s24 }
  0x14   :  { %p2452_p9 = scmp.lt.u32.totalorder %s2448_s27, %s3230_s4 }
  0x16   :  { %p2454_p10 = pnand %p2452_p9, %p2449_p8 }
  0x18   :  { %2457 = shalt.err (!%p2454_p10)
}
  0x19   :  { %s2458_s12 = scalar_lea.vmem %s40_s24, 3072  ;;  %p2463_p12 = scmp.lt.s32.totalorder %s40_s24, %s40_s24 }
  0x1a   :  { %p2459_p11 = scmp.ne.s32.totalorder %s40_s24, %s2458_s12  ;;  %p2464_p13 = scmp.lt.s32.totalorder %s2458_s12, %s2458_s12 }
  0x1c   :  { %p2465_p0 = por %p2464_p13, %p2463_p12 }
  0x1e   :  { %p2466_p1 = pnand %p2465_p0, %p2459_p11 }
  0x20   :  { %2469 = shalt.err (!%p2466_p1)
}
  0x21   :  { %s2478_s2 = smov 192   ;;  %s2479_s10 = smov 12  }
  0x22   :  { %45 = dma.hbm_to_vmem [thread:$0]  %s3230_s4, 3072, %s40_s24, [#allocation5], %s2478_s2, %s2478_s2, %s2479_s10  }
  0x23   :  { %2470 = dma.done.wait [#allocation3], 1536  }
  0x24   :  { %2471 = vsyncadd [#allocation3], 4294965760 }
  0x25   :  { %2472 = dma.done.wait [#allocation5], 3072  }
  0x26   :  { %2473 = vsyncadd [#allocation5], 4294964224  ;;  %v3236_v0 = vmov 0   ;;  %v63_v1 = vld [vmem:[%s3226_s0 + $0x10] sm:$0xff]  ;;  %v61_v2 = vld [vmem:[%s3226_s0] sm:$0xff]  ;;  %v69_v16 = vlaneseq  ;;  %vm155_vm4 = vcmask 523264  }
  0x27   :  { %2241 = vset.pattern.permute.xlu1 %v3236_v0  ;;  %2240 = vset.pattern.permute.xlu0 %v3236_v0  ;;  %v64_v3 = vld [vmem:[%s3226_s0 + $0x18] sm:$0xff]  ;;  %v62_v4 = vld [vmem:[%s3226_s0 + $0x8] sm:$0xff]  ;;  %v2242_v5 = vld [vmem:[%s3227_s1] sm:$0xff]   ;;  %v3238_v22 = vmov 0.0   ;;  %vm341_vm9 = vcmask 261120   ;;  %vm2482_vm10 = vmmov 0  }
  0x28   :  { %386 = vmatprep.mubr.bf16.mxu1 %v3236_v0  ;;  %78 = vperm.xlu1 %2241, %v63_v1   ;;  %v66_v6 = vld [vmem:[%s3226_s0 + $0x28] sm:$0xff]  ;;  %v65_v8 = vld [vmem:[%s3226_s0 + $0x20] sm:$0xff]  ;;  %v2244_v9 = vld [vmem:[%s3227_s1 + $0x10] sm:$0xff]   ;;  %v70_v17 = vand.u32 127, %v69_v16 }
  0x29   :  { %72 = vperm.xlu0 %2240, %v61_v2   ;;  %v2243_v7 = vld [vmem:[%s3227_s1 + $0x8] sm:$0xff]   ;;  %2015 = vmatprep.subr.bf16.mxu0 %v2242_v5  ;;  %v68_v10 = vld [vmem:[%s3226_s0 + $0x38] sm:$0xff]  ;;  %v67_v11 = vld [vmem:[%s3226_s0 + $0x30] sm:$0xff] }
  0x2a   :  { %2016 = vmatpush3.bf16.msra.mxu0 %v2242_v5  ;;  %v2245_v12 = vld [vmem:[%s3227_s1 + $0x18] sm:$0xff]   ;;  %v2248_v13 = vld [vmem:[#allocation2 + $0xc] ss:$24 sps:$4 sm:$0xff]   ;;  %v2246_v29 = vld [vmem:[#allocation2 + $0x8] ss:$24 sps:$4 sm:$0xff]  }
  0x2b   :  { %2017 = vmatprep.subr.bf16.mxu0 %v2243_v7  ;;  %v2249_v14 = vld [vmem:[#allocation2 + $0x4] ss:$24 sps:$4 sm:$0xff]   ;;  %v2251_v15 = vld [vmem:[#allocation2] ss:$24 sps:$4 sm:$0xff]   ;;  %v2252_v40 = vld [vmem:[#allocation2 + $0x34] ss:$24 sps:$4 sm:$0xff]  }
  0x2c   :  { %81 = vperm.xlu1 %2241, %v64_v3   ;;  %354 = vmatprep.subr.bf16.mxu1 %v2249_v14  ;;  %v2257_v41 = vld [vmem:[#allocation2 + $0x3c] ss:$24 sps:$4 sm:$0xff]   ;;  %v2254_v42 = vld [vmem:[#allocation2 + $0x30] ss:$24 sps:$4 sm:$0xff]   ;;  %v2615_v52 = vld [vmem:[#allocation4] ss:$12 sps:$4 sm:$0xff]  }
  0x2d   :  { %75 = vperm.xlu0 %2240, %v62_v4   ;;  %355 = vmatpush1.bf16.msra.mxu1 %v2251_v15  ;;  %v2255_v43 = vld [vmem:[#allocation2 + $0x38] ss:$24 sps:$4 sm:$0xff]   ;;  %v2260_v44 = vld [vmem:[#allocation2 + $0x14] ss:$24 sps:$4 sm:$0xff]   ;;  %v2617_v54 = vld [vmem:[#allocation4 + $0x1c] ss:$12 sps:$4 sm:$0xff]  }
  0x2e   :  { %2018 = vmatpush3.bf16.msra.mxu0 %v2243_v7  ;;  %356 = vmatprep.subr.bf16.mxu1 %v2252_v40  ;;  %v2610_v45 = vld [vmem:[#allocation4 + $0x4] ss:$12 sps:$4 sm:$0xff]   ;;  %v2273_v57 = vld [vmem:[#allocation2 + $0x40] ss:$24 sps:$4 sm:$0xff]   ;;  %v2645_v4 = vld [vmem:[#allocation4 + $0x48] ss:$12 sps:$4 sm:$0xff]  }
  0x2f   :  { %2019 = vmatprep.subr.bf16.mxu0 %v2244_v9  ;;  %v2258_v51 = vld [vmem:[#allocation2 + $0x10] ss:$24 sps:$4 sm:$0xff]   ;;  %v2275_v55 = vld [vmem:[#allocation2 + $0x44] ss:$24 sps:$4 sm:$0xff]   ;;  %v2626_v59 = vld [vmem:[#allocation4 + $0x34] ss:$12 sps:$4 sm:$0xff]  }
  0x30   :  { %87 = vperm.xlu1 %2241, %v66_v6   ;;  %v2622_v56 = vld [vmem:[#allocation4 + $0x18] ss:$12 sps:$4 sm:$0xff]   ;;  %v2632_v1 = vld [vmem:[#allocation4 + $0x30] ss:$12 sps:$4 sm:$0xff]   ;;  %v2653_v6 = vld [vmem:[#allocation4 + $0x60] ss:$12 sps:$4 sm:$0xff]  }
  0x31   :  { %84 = vperm.xlu0 %2240, %v65_v8   ;;  %357 = vmatpush1.bf16.msra.mxu1 %v2254_v42  ;;  %v2637_v3 = vld [vmem:[#allocation4 + $0x4c] ss:$12 sps:$4 sm:$0xff]   ;;  %v2650_v5 = vld [vmem:[#allocation4 + $0x64] ss:$12 sps:$4 sm:$0xff]   ;;  %v2656_v7 = vld [vmem:[#allocation4 + $0x7c] ss:$12 sps:$4 sm:$0xff]  }
  0x32   :  { %2020 = vmatpush3.bf16.msra.mxu0 %v2244_v9  ;;  %493 = vmatprep.subr.bf16.mxu1 %v2260_v44  ;;  %v2663_v8 = vld [vmem:[#allocation4 + $0x78] ss:$12 sps:$4 sm:$0xff]   ;;  %v2668_v9 = vld [vmem:[#allocation4 + $0x94] ss:$12 sps:$4 sm:$0xff]  }
  0x33   :  { %2021 = vmatprep.subr.bf16.mxu0 %v2245_v12  ;;  %v2693_v14 = vld [vmem:[#allocation4 + $0x20] ss:$12 sps:$4 sm:$0xff]   ;;  %v2701_v15 = vld [vmem:[#allocation4 + $0x38] ss:$12 sps:$4 sm:$0xff]  }
  0x34   :  { %93 = vperm.xlu1 %2241, %v68_v10   ;;  %v2671_v10 = vld [vmem:[#allocation4 + $0x90] ss:$12 sps:$4 sm:$0xff]  }
  0x35   :  { %90 = vperm.xlu0 %2240, %v67_v11   ;;  %v2674_v11 = vld [vmem:[#allocation4 + $0xac] ss:$12 sps:$4 sm:$0xff]  }
  0x36   :  { %2022 = vmatpush3.bf16.msra.mxu0 %v2245_v12  ;;  %v2681_v12 = vld [vmem:[#allocation4 + $0xa8] ss:$12 sps:$4 sm:$0xff]  }
  0x37   :  { %427 = vmatprep.subr.bf16.mxu0 %v2248_v13  ;;  %v2687_v13 = vld [vmem:[#allocation4 + $0x8] ss:$12 sps:$4 sm:$0xff]  }
  0xa7   :  { %v79_v18 = vpop.permute.xlu1 %78 }
  0xa8   :  { %v73_v19 = vpop.permute.xlu0 %72  ;;  %vm97_vm0 = vcmp.eq.s32.totalorder %v79_v18, %v70_v17  ;;  %v2716_v18 = vld [vmem:[#allocation4 + $0x68] ss:$12 sps:$4 sm:$0xff]  }
  0xa9   :  { %vm95_vm1 = vcmp.eq.s32.totalorder %v73_v19, %v70_v17  ;;  %v1802_v23 = vsel %vm97_vm0, 1.0, %v3238_v22  ;;  %v2724_v19 = vld [vmem:[#allocation4 + $0x80] ss:$12 sps:$4 sm:$0xff]  }
  0xaa   :  { %v1800_v24 = vsel %vm95_vm1, 1.0, %v3238_v22 }
  0xab   :  { %v82_v20 = vpop.permute.xlu1 %81 }
  0xac   :  { %v76_v21 = vpop.permute.xlu0 %75  ;;  %vm98_vm2 = vcmp.eq.s32.totalorder %v82_v20, %v70_v17  ;;  %v2731_v20 = vld [vmem:[#allocation4 + $0x98] ss:$12 sps:$4 sm:$0xff]  }
  0xad   :  { %vm96_vm3 = vcmp.eq.s32.totalorder %v76_v21, %v70_v17  ;;  %v1803_v25 = vsel %vm98_vm2, 1.0, %v3238_v22  ;;  %v2739_v21 = vld [vmem:[#allocation4 + $0xb0] ss:$12 sps:$4 sm:$0xff]  }
  0xae   :  { %v1801_v26 = vsel %vm96_vm3, 1.0, %v3238_v22  ;;  %v120_v27 = vpack.c.bf16 %v1803_v25, %v1802_v23  ;;  %v2770_v23 = vshrl.u32 %v69_v16, 7 }
  0xaf   :  { %v119_v28 = vpack.c.bf16 %v1801_v26, %v1800_v24  ;;  %v88_v30 = vpop.permute.xlu1 %87  ;;  %v2777_v26 = vld [vmem:[%s3229_s3] sm:$0x3f] }
  0xb0   :  { %v85_v31 = vpop.permute.xlu0 %84  ;;  %vm100_vm5 = vcmp.eq.s32.totalorder %v88_v30, %v70_v17  ;;  %v253_v24 = vsub.s32 0, %v2770_v23  ;;  %v261_v25 = vsub.s32 2, %v2770_v23 }
  0xb1   :  { %vm99_vm6 = vcmp.eq.s32.totalorder %v85_v31, %v70_v17  ;;  %2023 = vmatprep.mubr.msk.bf16.mxu0 %vm155_vm4, %v119_v28  ;;  %v1805_v32 = vsel %vm100_vm5, 1.0, %v3238_v22 }
  0xb2   :  { %v1804_v33 = vsel %vm99_vm6, 1.0, %v3238_v22  ;;  %2024 = vmatmul.mubr.msk.bf16.vlgmr.msra.gmra.mrb[0].mxu0 %vm155_vm4, %v120_v27  ;;  %v257_v27 = vsub.s32 1, %v2770_v23  ;;  %v254_v30 = vrot.slane %v2777_v26, %v253_v24  ;;  %v2784_v31 = vrot.slane %v2777_v26, %v261_v25 }
  0xb3   :  { %v121_v34 = vpack.c.bf16 %v1805_v32, %v1804_v33  ;;  %428 = vmatpush1.bf16.msra.mxu0 %v2246_v29  ;;  %v94_v35 = vpop.permute.xlu1 %93 }
  0xb4   :  { %v91_v36 = vpop.permute.xlu0 %90  ;;  %vm102_vm7 = vcmp.eq.s32.totalorder %v94_v35, %v70_v17  ;;  %429 = vmatprep.subr.bf16.mxu0 %v2257_v41  ;;  %v258_v33 = vrot.slane %v2777_v26, %v257_v27 }
  0xb5   :  { %vm101_vm8 = vcmp.eq.s32.totalorder %v91_v36, %v70_v17  ;;  %2027 = vmatprep.mubr.msk.bf16.mxu0 %vm155_vm4, %v121_v34  ;;  %v1807_v37 = vsel %vm102_vm7, 1.0, %v3238_v22  ;;  %v2709_v17 = vld [vmem:[#allocation4 + $0x50] ss:$12 sps:$4 sm:$0xff]  }
  0xb6   :  { %v1806_v38 = vsel %vm101_vm8, 1.0, %v3238_v22 }
  0xb7   :  { %v122_v39 = vpack.c.bf16 %v1807_v37, %v1806_v38  ;;  %430 = vmatpush1.bf16.msra.mxu0 %v2255_v43 }
  0xb8   :  { %719 = vmatprep.subr.bf16.mxu0 %v2610_v45 }
  0xba   :  { %2028 = vmatmul.mubr.msk.bf16.gmra.mrb[4].mxu0 %vm155_vm4, %v122_v39 }
  0xbb   :  { %459 = vmatprep.mubr.bf16.mxu0 %v3236_v0 }
 0x185   :  { %v2025_v46 = vpop.f32.mrb[0].mxu0 }
 0x186   :  { %v202_v47 = vpop.f32.mrb[1].mxu0 }
 0x187   :  { %v2026_v48 = vpop.f32.mrb[2].mxu0 }
 0x188   :  { %v2613_v49 = vpack.c.bf16 %v2026_v48, %v2025_v46  ;;  %v205_v50 = vpop.f32.mrb[3].mxu0 }
 0x189   :  { %v233_v53 = vpack.c.bf16 %v205_v50, %v202_v47 }
 0x18b   :  { %1828 = vmatmul.mubr.msk.bf16.vlgmr.msra.gmra.mrb[0].mxu1 %vm341_vm9, %v233_v53  ;;  %1832 = vmatmul.mubr.msk.bf16.vlgmr.msra.gmra.mrb[8].mxu0 %vm341_vm9, %v233_v53 }
 0x18c   :  { %494 = vmatpush1.bf16.msra.mxu1 %v2258_v51  ;;  %720 = vmatpush1.bf16.msra.mxu0 %v2615_v52 }
 0x18d   :  { %v2029_v58 = vpop.f32.mrb[4].mxu0  ;;  %721 = vmatprep.subr.bf16.mxu0 %v2617_v54  ;;  %396 = vmatprep.mubr.bf16.mxu1 %v3236_v0 }
 0x18e   :  { %v218_v60 = vpop.f32.mrb[5].mxu0  ;;  %467 = vmatprep.mubr.bf16.mxu0 %v3236_v0  ;;  %495 = vmatprep.subr.bf16.mxu1 %v2275_v55 }
 0x18f   :  { %v2030_v61 = vpop.f32.mrb[6].mxu0 }
 0x190   :  { %v2629_v62 = vpack.c.bf16 %v2030_v61, %v2029_v58  ;;  %v221_v63 = vpop.f32.mrb[7].mxu0  ;;  %722 = vmatpush1.bf16.msra.mxu0 %v2622_v56  ;;  %496 = vmatpush1.bf16.msra.mxu1 %v2273_v57 }
 0x191   :  { %v2634_v2 = vpack.c.bf16 %v221_v63, %v218_v60  ;;  %723 = vmatprep.subr.bf16.mxu0 %v2626_v59  ;;  %2031 = vmatprep.subr.bf16.mxu1 %v3238_v22 }
 0x193   :  { %1829 = vmatmul.mubr.msk.bf16.gmra.mrb[4].mxu1 %vm341_vm9, %v2613_v49  ;;  %1833 = vmatmul.mubr.msk.bf16.gmra.mrb[12].mxu0 %vm341_vm9, %v2613_v49 }
 0x194   :  { %724 = vmatpush1.bf16.msra.mxu0 %v2632_v1  ;;  %406 = vmatprep.mubr.bf16.mxu1 %v3236_v0 }
 0x195   :  { %725 = vmatprep.subr.bf16.mxu0 %v2637_v3  ;;  %475 = vmatprep.mubr.bf16.mxu0 %v3236_v0 }
 0x198   :  { %726 = vmatpush1.bf16.msra.mxu0 %v2645_v4 }
 0x199   :  { %727 = vmatprep.subr.bf16.mxu0 %v2650_v5 }
 0x19b   :  { %1830 = vmatmul.mubr.msk.bf16.gmra.mrb[8].mxu1 %vm341_vm9, %v2634_v2  ;;  %1834 = vmatmul.mubr.msk.bf16.gmra.mrb[16].mxu0 %vm341_vm9, %v2634_v2 }
 0x19c   :  { %728 = vmatpush1.bf16.msra.mxu0 %v2653_v6  ;;  %416 = vmatprep.mubr.bf16.mxu1 %v3236_v0 }
 0x19d   :  { %729 = vmatprep.subr.bf16.mxu0 %v2656_v7  ;;  %483 = vmatprep.mubr.bf16.mxu0 %v3236_v0 }
 0x1a0   :  { %730 = vmatpush1.bf16.msra.mxu0 %v2663_v8 }
 0x1a1   :  { %731 = vmatprep.subr.bf16.mxu0 %v2668_v9 }
 0x1a3   :  { %1831 = vmatmul.mubr.msk.bf16.gmra.mrb[12].mxu1 %vm341_vm9, %v2629_v62  ;;  %1835 = vmatmul.mubr.msk.bf16.gmra.mrb[20].mxu0 %vm341_vm9, %v2629_v62 }
 0x1a4   :  { %732 = vmatpush1.bf16.msra.mxu0 %v2671_v10  ;;  %525 = vmatprep.mubr.bf16.mxu1 %v3236_v0 }
 0x1a5   :  { %733 = vmatprep.subr.bf16.mxu0 %v2674_v11  ;;  %751 = vmatprep.mubr.bf16.mxu0 %v3236_v0 }
 0x1a8   :  { %734 = vmatpush1.bf16.msra.mxu0 %v2681_v12 }
 0x1a9   :  { %823 = vmatprep.subr.bf16.mxu0 %v2610_v45 }
 0x1ab   :  { %1836 = vmatmul.mubr.msk.bf16.vlgmr.msra.gmra.mrb[16].mxu1 %vm341_vm9, %v233_v53  ;;  %752 = vmatmul.mubr.bf16.vlgmr.msra.gmra.mrb[24].mxu0 %v3236_v0 }
 0x1ac   :  { %2032 = vmatpush3.bf16.msra.mxu1 %v2687_v13  ;;  %531 = vmatprep.mubr.bf16.mxu1 %v3236_v0 }
 0x1ad   :  { %2033 = vmatprep.subr.bf16.mxu1 %v3238_v22  ;;  %824 = vmatpush1.bf16.msra.mxu0 %v2615_v52 }
 0x1ae   :  { %825 = vmatprep.subr.bf16.mxu0 %v2617_v54  ;;  %855 = vmatprep.mubr.bf16.mxu0 %v3236_v0 }
 0x1b0   :  { %2034 = vmatpush3.bf16.msra.mxu1 %v2693_v14 }
 0x1b1   :  { %2035 = vmatprep.subr.bf16.mxu1 %v3238_v22  ;;  %826 = vmatpush1.bf16.msra.mxu0 %v2622_v56 }
 0x1b2   :  { %827 = vmatprep.subr.bf16.mxu0 %v2626_v59 }
 0x1b3   :  { %1837 = vmatmul.mubr.msk.bf16.gmra.mrb[20].mxu1 %vm341_vm9, %v2613_v49 }
 0x1b4   :  { %2036 = vmatpush3.bf16.msra.mxu1 %v2701_v15  ;;  %537 = vmatprep.mubr.bf16.mxu1 %v3236_v0 }
 0x1b5   :  { %2037 = vmatprep.subr.bf16.mxu1 %v3238_v22  ;;  %828 = vmatpush1.bf16.msra.mxu0 %v2632_v1 }
 0x1b6   :  { %829 = vmatprep.subr.bf16.mxu0 %v2637_v3 }
 0x1b8   :  { %2038 = vmatpush3.bf16.msra.mxu1 %v2709_v17 }
 0x1b9   :  { %2039 = vmatprep.subr.bf16.mxu1 %v3238_v22  ;;  %830 = vmatpush1.bf16.msra.mxu0 %v2645_v4 }
 0x1ba   :  { %831 = vmatprep.subr.bf16.mxu0 %v2650_v5 }
 0x1bb   :  { %1838 = vmatmul.mubr.msk.bf16.gmra.mrb[24].mxu1 %vm341_vm9, %v2634_v2 }
 0x1bc   :  { %2040 = vmatpush3.bf16.msra.mxu1 %v2716_v18  ;;  %543 = vmatprep.mubr.bf16.mxu1 %v3236_v0 }
 0x1bd   :  { %2041 = vmatprep.subr.bf16.mxu1 %v3238_v22  ;;  %832 = vmatpush1.bf16.msra.mxu0 %v2653_v6 }
 0x1be   :  { %833 = vmatprep.subr.bf16.mxu0 %v2656_v7 }
 0x1c0   :  { %2042 = vmatpush3.bf16.msra.mxu1 %v2724_v19 }
 0x1c1   :  { %2043 = vmatprep.subr.bf16.mxu1 %v3238_v22  ;;  %834 = vmatpush1.bf16.msra.mxu0 %v2663_v8 }
 0x1c2   :  { %835 = vmatprep.subr.bf16.mxu0 %v2668_v9 }
 0x1c3   :  { %1839 = vmatmul.mubr.msk.bf16.gmra.mrb[28].mxu1 %vm341_vm9, %v2629_v62 }
 0x1c4   :  { %2044 = vmatpush3.bf16.msra.mxu1 %v2731_v20  ;;  %2047 = vmatprep.mubr.msk.bf16.mxu1 %vm2482_vm10, %v3238_v22 }
 0x1c5   :  { %2045 = vmatprep.subr.bf16.mxu1 %v3238_v22  ;;  %836 = vmatpush1.bf16.msra.mxu0 %v2671_v10 }
 0x1c6   :  { %837 = vmatprep.subr.bf16.mxu0 %v2674_v11 }
 0x1c8   :  { %2046 = vmatpush3.bf16.msra.mxu1 %v2739_v21 }
 0x1c9   :  { %2051 = vmatprep.subr.bf16.mxu1 %v3238_v22  ;;  %838 = vmatpush1.bf16.msra.mxu0 %v2681_v12 }
 0x1ca   :  { %927 = vmatprep.subr.bf16.mxu0 %v2610_v45 }
 0x1cb   :  { %2048 = vmatmul.mubr.bf16.vlgmr.msra.gmra.mrb[32].mxu1 %v3236_v0 }
 0x1cc   :  { %2052 = vmatpush3.bf16.msra.mxu1 %v2687_v13  ;;  %2067 = vmatprep.mubr.msk.bf16.mxu1 %vm2482_vm10, %v3238_v22 }
 0x1cd   :  { %2053 = vmatprep.subr.bf16.mxu1 %v3238_v22 }
 0x1d0   :  { %2054 = vmatpush3.bf16.msra.mxu1 %v2693_v14 }
 0x1d1   :  { %2055 = vmatprep.subr.bf16.mxu1 %v3238_v22 }
 0x1d4   :  { %2056 = vmatpush3.bf16.msra.mxu1 %v2701_v15 }
 0x1d5   :  { %2057 = vmatprep.subr.bf16.mxu1 %v3238_v22 }
 0x1d8   :  { %2058 = vmatpush3.bf16.msra.mxu1 %v2709_v17 }
 0x1d9   :  { %2059 = vmatprep.subr.bf16.mxu1 %v3238_v22 }
 0x1dc   :  { %2060 = vmatpush3.bf16.msra.mxu1 %v2716_v18 }
 0x1dd   :  { %2061 = vmatprep.subr.bf16.mxu1 %v3238_v22 }
 0x1e0   :  { %2062 = vmatpush3.bf16.msra.mxu1 %v2724_v19 }
 0x1e1   :  { %2063 = vmatprep.subr.bf16.mxu1 %v3238_v22 }
 0x1e4   :  { %2064 = vmatpush3.bf16.msra.mxu1 %v2731_v20 }
 0x1e5   :  { %2065 = vmatprep.subr.bf16.mxu1 %v3238_v22 }
 0x1e8   :  { %2066 = vmatpush3.bf16.msra.mxu1 %v2739_v21 }
 0x1e9   :  { %2071 = vmatprep.subr.bf16.mxu1 %v3238_v22 }
 0x25e   :  { %v388_v28 = vpop.f32.mrb[0].mxu1  ;;  %v2780_v29 = vpop.f32.mrb[8].mxu0 }
 0x25f   :  { %v390_v16 = vpop.f32.mrb[1].mxu1  ;;  %v463_v32 = vpop.f32.mrb[9].mxu0  ;;  %v389_v22 = vadd.f32 %v388_v28, %v254_v30 }
 0x260   :  { %v392_v34 = vpop.f32.mrb[2].mxu1  ;;  %v464_v35 = vpop.f32.mrb[10].mxu0 }
 0x261   :  { %v2787_v36 = vadd.f32 %v392_v34, %v254_v30  ;;  %v2790_v37 = vadd.f32 %v464_v35, %v2784_v31  ;;  %v394_v38 = vpop.f32.mrb[3].mxu1  ;;  %v466_v39 = vpop.f32.mrb[11].mxu0 }
 0x262   :  { %v2792_v40 = vadd.f32 %v394_v38, %v258_v33 }
 0x266   :  { %v398_v41 = vpop.f32.mrb[4].mxu1  ;;  %v469_v42 = vpop.f32.mrb[12].mxu0 }
 0x267   :  { %v2794_v43 = vadd.f32 %v398_v41, %v254_v30  ;;  %v2797_v44 = vadd.f32 %v469_v42, %v2784_v31  ;;  %v400_v46 = vpop.f32.mrb[5].mxu1  ;;  %v471_v47 = vpop.f32.mrb[13].mxu0  ;;  %v265_v42 = vsub.s32 3, %v2770_v23 }
 0x268   :  { %v2799_v48 = vadd.f32 %v400_v46, %v258_v33  ;;  %v402_v49 = vpop.f32.mrb[6].mxu1  ;;  %v472_v50 = vpop.f32.mrb[14].mxu0 }
 0x269   :  { %v2801_v51 = vadd.f32 %v402_v49, %v254_v30  ;;  %v2804_v53 = vadd.f32 %v472_v50, %v2784_v31  ;;  %v404_v55 = vpop.f32.mrb[7].mxu1  ;;  %v474_v57 = vpop.f32.mrb[15].mxu0  ;;  %v266_v49 = vrot.slane %v2777_v26, %v265_v42 }
 0x26a   :  { %v2806_v58 = vadd.f32 %v404_v55, %v258_v33 }
 0x26e   :  { %v408_v60 = vpop.f32.mrb[8].mxu1  ;;  %v477_v61 = vpop.f32.mrb[16].mxu0 }
 0x26f   :  { %v2808_v62 = vadd.f32 %v408_v60, %v254_v30  ;;  %v2811_v63 = vadd.f32 %v477_v61, %v2784_v31  ;;  %v410_v2 = vpop.f32.mrb[9].mxu1  ;;  %v479_v24 = vpop.f32.mrb[17].mxu0 }
 0x270   :  { %v2813_v25 = vadd.f32 %v410_v2, %v258_v33  ;;  %v412_v27 = vpop.f32.mrb[10].mxu1  ;;  %v480_v32 = vpop.f32.mrb[18].mxu0 }
 0x271   :  { %v2815_v34 = vadd.f32 %v412_v27, %v254_v30  ;;  %v2818_v35 = vadd.f32 %v480_v32, %v2784_v31  ;;  %v414_v38 = vpop.f32.mrb[11].mxu1  ;;  %v482_v39 = vpop.f32.mrb[19].mxu0 }
 0x272   :  { %v2820_v41 = vadd.f32 %v414_v38, %v258_v33 }
 0x273   :  { %3240 = vst [vmem:[#allocation8_spill] sm:$0xff] %v2815_v34  ;;  %3241 = vst [vmem:[#allocation9_spill] sm:$0xff] %v2818_v35 }
 0x274   :  { %3242 = vst [vmem:[#allocation10_spill] sm:$0xff] %v2820_v41 }
 0x276   :  { %v418_v46 = vpop.f32.mrb[12].mxu1  ;;  %v485_v47 = vpop.f32.mrb[20].mxu0 }
 0x277   :  { %v2824_v50 = vadd.f32 %v418_v46, %v254_v30  ;;  %v2827_v55 = vadd.f32 %v485_v47, %v2784_v31  ;;  %v420_v57 = vpop.f32.mrb[13].mxu1  ;;  %v487_v60 = vpop.f32.mrb[21].mxu0  ;;  %v391_v47 = vadd.f32 %v390_v16, %v258_v33 }
 0x278   :  { %v2829_v61 = vadd.f32 %v420_v57, %v258_v33  ;;  %v422_v2 = vpop.f32.mrb[14].mxu1  ;;  %v488_v24 = vpop.f32.mrb[22].mxu0 }
 0x279   :  { %3243 = vst [vmem:[#allocation11_spill] sm:$0xff] %v2824_v50  ;;  %3244 = vst [vmem:[#allocation12_spill] sm:$0xff] %v2827_v55  ;;  %v2831_v27 = vadd.f32 %v422_v2, %v254_v30  ;;  %v2834_v32 = vadd.f32 %v488_v24, %v2784_v31  ;;  %v424_v38 = vpop.f32.mrb[15].mxu1  ;;  %v490_v39 = vpop.f32.mrb[23].mxu0 }
 0x27a   :  { %3245 = vst [vmem:[#allocation13_spill] sm:$0xff] %v2829_v61  ;;  %v2836_v0 = vadd.f32 %v424_v38, %v258_v33  ;;  %v491_v42 = vadd.f32 %v490_v39, %v266_v49 }
 0x27b   :  { %3246 = vst [vmem:[#allocation14_spill] sm:$0xff] %v2831_v27  ;;  %3247 = vst [vmem:[#allocation15_spill] sm:$0xff] %v2834_v32 }
 0x27c   :  { %3248 = vst [vmem:[#allocation16_spill] sm:$0xff] %v2836_v0  ;;  %v1881_v46 = vmul.f32 -1.442695, %v491_v42 }
 0x27e   :  { %2312 = vpow2.f32 %v1881_v46  ;;  %v527_v55 = vpop.f32.mrb[16].mxu1  ;;  %v753_v60 = vpop.f32.mrb[24].mxu0  ;;  %v1883_v46 = vld [vmem:[%s3232_s6] ss:$0 sm:$0xff] }
 0x27f   :  { %v800_v57 = vadd.f32 %v753_v60, %v389_v22  ;;  %v528_v61 = vpop.f32.mrb[17].mxu1  ;;  %v755_v50 = vpop.f32.mrb[25].mxu0 }
 0x280   :  { %v807_v35 = vadd.f32 %v755_v50, %v391_v47  ;;  %v529_v2 = vpop.f32.mrb[18].mxu1  ;;  %v757_v27 = vpop.f32.mrb[26].mxu0  ;;  %v269_v61 = vsub.s32 4, %v2770_v23 }
 0x281   :  { %v1865_v41 = vmul.f32 -1.442695, %v800_v57  ;;  %v530_v24 = vpop.f32.mrb[19].mxu1  ;;  %v758_v32 = vpop.f32.mrb[27].mxu0 }
 0x282   :  { %v1866_v30 = vmul.f32 -1.442695, %v807_v35  ;;  %v273_v32 = vsub.s32 5, %v2770_v23 }
 0x283   :  { %2314 = vpow2.f32 %v1865_v41 }
 0x286   :  { %v533_v34 = vpop.f32.mrb[20].mxu1 }
 0x287   :  { %v534_v38 = vpop.f32.mrb[21].mxu1  ;;  %v270_v34 = vrot.slane %v2777_v26, %v269_v61 }
 0x288   :  { %v2313_v0 = vpop.eup %2312  ;;  %v535_v49 = vpop.f32.mrb[22].mxu1 }
 0x289   :  { %v1553_v39 = vadd.f32 1.0, %v2313_v0  ;;  %v536_v28 = vpop.f32.mrb[23].mxu1  ;;  %v274_v0 = vrot.slane %v2777_v26, %v273_v32 }
 0x28b   :  { %2316 = vrcp.f32 %v1553_v39  ;;  %v2848_v39 = vld [vmem:[%s3231_s5] ss:$0 sm:$0xff] }
 0x28c   :  { %2318 = vpow2.f32 %v1866_v30 }
 0x28d   :  { %v2315_v33 = vpop.eup %2314 }
 0x28e   :  { %v539_v16 = vpop.f32.mrb[24].mxu1  ;;  %v804_v27 = vadd.f32 1.0, %v2315_v33 }
 0x28f   :  { %v540_v22 = vpop.f32.mrb[25].mxu1 }
 0x290   :  { %v541_v55 = vpop.f32.mrb[26].mxu1  ;;  %2320 = vrcp.f32 %v804_v27 }
 0x291   :  { %v542_v50 = vpop.f32.mrb[27].mxu1  ;;  %v462_v55 = vadd.f32 %v2780_v29, %v2784_v31 }
 0x295   :  { %v2317_v42 = vpop.eup %2316 }
 0x296   :  { %v545_v41 = vpop.f32.mrb[28].mxu1  ;;  %v2319_v2 = vpop.eup %2318  ;;  %v1569_v38 = vmul.f32 %v2317_v42, %v1883_v46 }
 0x297   :  { %v546_v35 = vpop.f32.mrb[29].mxu1  ;;  %v811_v26 = vadd.f32 1.0, %v2319_v2 }
 0x298   :  { %v547_v47 = vpop.f32.mrb[30].mxu1 }
 0x299   :  { %v548_v60 = vadd.f32 %v547_v47, %v270_v34  ;;  %v549_v57 = vpop.f32.mrb[31].mxu1 }
 0x29a   :  { %v550_v24 = vadd.f32 %v549_v57, %v274_v0  ;;  %v2321_v33 = vpop.eup %2320 }
 0x29b   :  { %v1882_v49 = vmul.f32 -1.442695, %v548_v60 }
 0x29c   :  { %v1570_v23 = vadd.f32 %v1569_v38, %v550_v24  ;;  %v3249_v24 = vmov 0.0   ;;  %v3250_v38 = vmov 0  }
 0x29d   :  { %2322 = vpow2.f32 %v1882_v49 }
 0x29e   :  { %v794_v28 = vpop.f32.mrb[32].mxu1  ;;  %2324 = vrcp.f32 %v811_v26 }
 0x29f   :  { %v814_v30 = vadd.f32 %v2848_v39, %v794_v28  ;;  %v2049_v16 = vpop.f32.mrb[33].mxu1 }
 0x2a0   :  { %v797_v22 = vpop.f32.mrb[34].mxu1 }
 0x2a1   :  { %v815_v50 = vmul.f32 %v2321_v33, %v814_v30  ;;  %v2050_v61 = vpop.f32.mrb[35].mxu1 }
 0x2a3   :  { %v816_v27 = vadd.f32 %v815_v50, %v462_v55 }
 0x2a5   :  { %2326 = vtanh.f32 %v816_v27 }
 0x2a7   :  { %v2323_v32 = vpop.eup %2322 }
 0x2a8   :  { %v1559_v34 = vadd.f32 1.0, %v2323_v32  ;;  %v2325_v41 = vpop.eup %2324 }
 0x2a9   :  { %v818_v0 = vsub.f32 1.0, %v2325_v41  ;;  %v820_v46 = vmul.f32 0.0, %v2325_v41 }
 0x2aa   :  { %2328 = vrcp.f32 %v1559_v34 }
 0x2ab   :  { %2330 = vtanh.f32 %v1570_v23 }
 0x2af   :  { %v2327_v42 = vpop.eup %2326 }
 0x2b0   :  { %v819_v35 = vmul.f32 %v2327_v42, %v818_v0 }
 0x2b2   :  { %v2853_v47 = vadd.f32 %v820_v46, %v819_v35 }
 0x2b4   :  { %v2329_v60 = vpop.eup %2328  ;;  %v822_v29 = vpack.c.bf16 %v2853_v47, %v2853_v47 }
 0x2b5   :  { %v1572_v31 = vsub.f32 1.0, %v2329_v60  ;;  %v2331_v57 = vpop.eup %2330 }
 0x2b6   :  { %856 = vmatmul.mubr.bf16.vlgmr.msra.gmra.mrb[28].mxu0 %v822_v29  ;;  %2068 = vmatmul.mubr.bf16.vlgmr.msra.gmra.mrb[36].mxu1 %v822_v29 }
 0x2b7   :  { %928 = vmatpush1.bf16.msra.mxu0 %v2615_v52  ;;  %2072 = vmatpush3.bf16.msra.mxu1 %v2687_v13  ;;  %v2859_v2 = vmul.f32 %v2331_v57, %v1572_v31 }
 0x2b8   :  { %929 = vmatprep.subr.bf16.mxu0 %v2617_v54  ;;  %2073 = vmatprep.subr.bf16.mxu1 %v3249_v24 }
 0x2b9   :  { %959 = vmatprep.mubr.bf16.mxu0 %v3250_v38  ;;  %2087 = vmatprep.mubr.msk.bf16.mxu1 %vm2482_vm10, %v3249_v24 }
 0x2bb   :  { %930 = vmatpush1.bf16.msra.mxu0 %v2622_v56  ;;  %2074 = vmatpush3.bf16.msra.mxu1 %v2693_v14 }
 0x2bc   :  { %931 = vmatprep.subr.bf16.mxu0 %v2626_v59  ;;  %2075 = vmatprep.subr.bf16.mxu1 %v3249_v24 }
 0x2bf   :  { %932 = vmatpush1.bf16.msra.mxu0 %v2632_v1  ;;  %2076 = vmatpush3.bf16.msra.mxu1 %v2701_v15 }
 0x2c0   :  { %933 = vmatprep.subr.bf16.mxu0 %v2637_v3  ;;  %2077 = vmatprep.subr.bf16.mxu1 %v3249_v24 }
 0x2c3   :  { %934 = vmatpush1.bf16.msra.mxu0 %v2645_v4  ;;  %2078 = vmatpush3.bf16.msra.mxu1 %v2709_v17 }
 0x2c4   :  { %935 = vmatprep.subr.bf16.mxu0 %v2650_v5  ;;  %2079 = vmatprep.subr.bf16.mxu1 %v3249_v24 }
 0x2c7   :  { %936 = vmatpush1.bf16.msra.mxu0 %v2653_v6  ;;  %2080 = vmatpush3.bf16.msra.mxu1 %v2716_v18 }
 0x2c8   :  { %937 = vmatprep.subr.bf16.mxu0 %v2656_v7  ;;  %2081 = vmatprep.subr.bf16.mxu1 %v3249_v24 }
 0x2cb   :  { %938 = vmatpush1.bf16.msra.mxu0 %v2663_v8  ;;  %2082 = vmatpush3.bf16.msra.mxu1 %v2724_v19 }
 0x2cc   :  { %939 = vmatprep.subr.bf16.mxu0 %v2668_v9  ;;  %2083 = vmatprep.subr.bf16.mxu1 %v3249_v24 }
 0x2cf   :  { %940 = vmatpush1.bf16.msra.mxu0 %v2671_v10  ;;  %2084 = vmatpush3.bf16.msra.mxu1 %v2731_v20 }
 0x2d0   :  { %941 = vmatprep.subr.bf16.mxu0 %v2674_v11  ;;  %2085 = vmatprep.subr.bf16.mxu1 %v3249_v24 }
 0x2d3   :  { %942 = vmatpush1.bf16.msra.mxu0 %v2681_v12  ;;  %2086 = vmatpush3.bf16.msra.mxu1 %v2739_v21 }
 0x2d4   :  { %1031 = vmatprep.subr.bf16.mxu0 %v2610_v45  ;;  %2091 = vmatprep.subr.bf16.mxu1 %v3249_v24 }
 0x389   :  { %v857_v49 = vpop.f32.mrb[28].mxu0  ;;  %v898_v23 = vpop.f32.mrb[36].mxu1 }
 0x38a   :  { %v904_v26 = vadd.f32 %v857_v49, %v2787_v36  ;;  %v859_v28 = vpop.f32.mrb[29].mxu0  ;;  %v2069_v30 = vpop.f32.mrb[37].mxu1  ;;  %v918_v42 = vadd.f32 %v2848_v39, %v898_v23 }
 0x38b   :  { %v911_v16 = vadd.f32 %v859_v28, %v2792_v40  ;;  %v861_v33 = vpop.f32.mrb[30].mxu0  ;;  %v901_v22 = vpop.f32.mrb[38].mxu1 }
 0x38c   :  { %v1867_v55 = vmul.f32 -1.442695, %v904_v26  ;;  %v862_v50 = vpop.f32.mrb[31].mxu0  ;;  %v2070_v61 = vpop.f32.mrb[39].mxu1 }
 0x38d   :  { %v1868_v27 = vmul.f32 -1.442695, %v911_v16 }
 0x38e   :  { %2332 = vpow2.f32 %v1867_v55 }
 0x38f   :  { %2334 = vpow2.f32 %v1868_v27 }
 0x398   :  { %v2333_v32 = vpop.eup %2332 }
 0x399   :  { %v908_v34 = vadd.f32 1.0, %v2333_v32  ;;  %v2335_v41 = vpop.eup %2334 }
 0x39a   :  { %v915_v0 = vadd.f32 1.0, %v2335_v41 }
 0x39b   :  { %2336 = vrcp.f32 %v908_v34 }
 0x39c   :  { %2338 = vrcp.f32 %v915_v0 }
 0x3a5   :  { %v2337_v36 = vpop.eup %2336 }
 0x3a6   :  { %v919_v35 = vmul.f32 %v2337_v36, %v918_v42  ;;  %v2339_v46 = vpop.eup %2338 }
 0x3a7   :  { %v922_v60 = vsub.f32 1.0, %v2339_v46  ;;  %v924_v57 = vmul.f32 %v2339_v46, %v2853_v47 }
 0x3a8   :  { %v920_v40 = vadd.f32 %v919_v35, %v2790_v37 }
 0x3aa   :  { %2340 = vtanh.f32 %v920_v40 }
 0x3b4   :  { %v2341_v29 = vpop.eup %2340 }
 0x3b5   :  { %v923_v31 = vmul.f32 %v2341_v29, %v922_v60 }
 0x3b7   :  { %v2899_v49 = vadd.f32 %v924_v57, %v923_v31 }
 0x3b9   :  { %v926_v26 = vpack.c.bf16 %v2899_v49, %v2899_v49 }
 0x3bb   :  { %960 = vmatmul.mubr.bf16.vlgmr.msra.gmra.mrb[32].mxu0 %v926_v26  ;;  %2088 = vmatmul.mubr.bf16.vlgmr.msra.gmra.mrb[40].mxu1 %v926_v26 }
 0x3bc   :  { %1032 = vmatpush1.bf16.msra.mxu0 %v2615_v52  ;;  %2092 = vmatpush3.bf16.msra.mxu1 %v2687_v13 }
 0x3bd   :  { %1033 = vmatprep.subr.bf16.mxu0 %v2617_v54  ;;  %2093 = vmatprep.subr.bf16.mxu1 %v3249_v24 }
 0x3be   :  { %1063 = vmatprep.mubr.bf16.mxu0 %v3250_v38  ;;  %2107 = vmatprep.mubr.msk.bf16.mxu1 %vm2482_vm10, %v3249_v24 }
 0x3c0   :  { %1034 = vmatpush1.bf16.msra.mxu0 %v2622_v56  ;;  %2094 = vmatpush3.bf16.msra.mxu1 %v2693_v14 }
 0x3c1   :  { %1035 = vmatprep.subr.bf16.mxu0 %v2626_v59  ;;  %2095 = vmatprep.subr.bf16.mxu1 %v3249_v24 }
 0x3c4   :  { %1036 = vmatpush1.bf16.msra.mxu0 %v2632_v1  ;;  %2096 = vmatpush3.bf16.msra.mxu1 %v2701_v15 }
 0x3c5   :  { %1037 = vmatprep.subr.bf16.mxu0 %v2637_v3  ;;  %2097 = vmatprep.subr.bf16.mxu1 %v3249_v24 }
 0x3c8   :  { %1038 = vmatpush1.bf16.msra.mxu0 %v2645_v4  ;;  %2098 = vmatpush3.bf16.msra.mxu1 %v2709_v17 }
 0x3c9   :  { %1039 = vmatprep.subr.bf16.mxu0 %v2650_v5  ;;  %2099 = vmatprep.subr.bf16.mxu1 %v3249_v24 }
 0x3cc   :  { %1040 = vmatpush1.bf16.msra.mxu0 %v2653_v6  ;;  %2100 = vmatpush3.bf16.msra.mxu1 %v2716_v18 }
 0x3cd   :  { %1041 = vmatprep.subr.bf16.mxu0 %v2656_v7  ;;  %2101 = vmatprep.subr.bf16.mxu1 %v3249_v24 }
 0x3d0   :  { %1042 = vmatpush1.bf16.msra.mxu0 %v2663_v8  ;;  %2102 = vmatpush3.bf16.msra.mxu1 %v2724_v19 }
 0x3d1   :  { %1043 = vmatprep.subr.bf16.mxu0 %v2668_v9  ;;  %2103 = vmatprep.subr.bf16.mxu1 %v3249_v24 }
 0x3d4   :  { %1044 = vmatpush1.bf16.msra.mxu0 %v2671_v10  ;;  %2104 = vmatpush3.bf16.msra.mxu1 %v2731_v20 }
 0x3d5   :  { %1045 = vmatprep.subr.bf16.mxu0 %v2674_v11  ;;  %2105 = vmatprep.subr.bf16.mxu1 %v3249_v24 }
 0x3d8   :  { %1046 = vmatpush1.bf16.msra.mxu0 %v2681_v12  ;;  %2106 = vmatpush3.bf16.msra.mxu1 %v2739_v21 }
 0x3d9   :  { %1135 = vmatprep.subr.bf16.mxu0 %v2610_v45  ;;  %2111 = vmatprep.subr.bf16.mxu1 %v3249_v24 }
 0x48e   :  { %v961_v37 = vpop.f32.mrb[32].mxu0  ;;  %v1002_v47 = vpop.f32.mrb[40].mxu1 }
 0x48f   :  { %v1008_v23 = vadd.f32 %v961_v37, %v2794_v43  ;;  %v963_v28 = vpop.f32.mrb[33].mxu0  ;;  %v2089_v30 = vpop.f32.mrb[41].mxu1  ;;  %v1022_v42 = vadd.f32 %v2848_v39, %v1002_v47 }
 0x490   :  { %v1015_v16 = vadd.f32 %v963_v28, %v2799_v48  ;;  %v965_v33 = vpop.f32.mrb[34].mxu0  ;;  %v1005_v22 = vpop.f32.mrb[42].mxu1 }
 0x491   :  { %v1869_v55 = vmul.f32 -1.442695, %v1008_v23  ;;  %v966_v50 = vpop.f32.mrb[35].mxu0  ;;  %v2090_v61 = vpop.f32.mrb[43].mxu1 }
 0x492   :  { %v1870_v27 = vmul.f32 -1.442695, %v1015_v16 }
 0x493   :  { %2342 = vpow2.f32 %v1869_v55 }
 0x494   :  { %2344 = vpow2.f32 %v1870_v27 }
 0x49d   :  { %v2343_v32 = vpop.eup %2342 }
 0x49e   :  { %v1012_v34 = vadd.f32 1.0, %v2343_v32  ;;  %v2345_v41 = vpop.eup %2344 }
 0x49f   :  { %v1019_v0 = vadd.f32 1.0, %v2345_v41 }
 0x4a0   :  { %2346 = vrcp.f32 %v1012_v34 }
 0x4a1   :  { %2348 = vrcp.f32 %v1019_v0 }
 0x4aa   :  { %v2347_v43 = vpop.eup %2346 }
 0x4ab   :  { %v1023_v36 = vmul.f32 %v2347_v43, %v1022_v42  ;;  %v2349_v35 = vpop.eup %2348 }
 0x4ac   :  { %v1026_v40 = vsub.f32 1.0, %v2349_v35  ;;  %v1028_v29 = vmul.f32 %v2349_v35, %v2899_v49 }
 0x4ad   :  { %v1024_v48 = vadd.f32 %v1023_v36, %v2797_v44 }
 0x4af   :  { %2350 = vtanh.f32 %v1024_v48 }
 0x4b9   :  { %v2351_v46 = vpop.eup %2350 }
 0x4ba   :  { %v1027_v60 = vmul.f32 %v2351_v46, %v1026_v40 }
 0x4bc   :  { %v2943_v31 = vadd.f32 %v1028_v29, %v1027_v60 }
 0x4be   :  { %v1030_v57 = vpack.c.bf16 %v2943_v31, %v2943_v31 }
 0x4c0   :  { %1064 = vmatmul.mubr.bf16.vlgmr.msra.gmra.mrb[36].mxu0 %v1030_v57  ;;  %2108 = vmatmul.mubr.bf16.vlgmr.msra.gmra.mrb[44].mxu1 %v1030_v57 }
 0x4c1   :  { %1136 = vmatpush1.bf16.msra.mxu0 %v2615_v52  ;;  %2112 = vmatpush3.bf16.msra.mxu1 %v2687_v13 }
 0x4c2   :  { %1137 = vmatprep.subr.bf16.mxu0 %v2617_v54  ;;  %2113 = vmatprep.subr.bf16.mxu1 %v3249_v24 }
 0x4c3   :  { %1167 = vmatprep.mubr.bf16.mxu0 %v3250_v38  ;;  %2127 = vmatprep.mubr.msk.bf16.mxu1 %vm2482_vm10, %v3249_v24 }
 0x4c5   :  { %1138 = vmatpush1.bf16.msra.mxu0 %v2622_v56  ;;  %2114 = vmatpush3.bf16.msra.mxu1 %v2693_v14 }
 0x4c6   :  { %1139 = vmatprep.subr.bf16.mxu0 %v2626_v59  ;;  %2115 = vmatprep.subr.bf16.mxu1 %v3249_v24 }
 0x4c9   :  { %1140 = vmatpush1.bf16.msra.mxu0 %v2632_v1  ;;  %2116 = vmatpush3.bf16.msra.mxu1 %v2701_v15 }
 0x4ca   :  { %1141 = vmatprep.subr.bf16.mxu0 %v2637_v3  ;;  %2117 = vmatprep.subr.bf16.mxu1 %v3249_v24 }
 0x4cd   :  { %1142 = vmatpush1.bf16.msra.mxu0 %v2645_v4  ;;  %2118 = vmatpush3.bf16.msra.mxu1 %v2709_v17 }
 0x4ce   :  { %1143 = vmatprep.subr.bf16.mxu0 %v2650_v5  ;;  %2119 = vmatprep.subr.bf16.mxu1 %v3249_v24 }
 0x4d1   :  { %1144 = vmatpush1.bf16.msra.mxu0 %v2653_v6  ;;  %2120 = vmatpush3.bf16.msra.mxu1 %v2716_v18 }
 0x4d2   :  { %1145 = vmatprep.subr.bf16.mxu0 %v2656_v7  ;;  %2121 = vmatprep.subr.bf16.mxu1 %v3249_v24 }
 0x4d5   :  { %1146 = vmatpush1.bf16.msra.mxu0 %v2663_v8  ;;  %2122 = vmatpush3.bf16.msra.mxu1 %v2724_v19 }
 0x4d6   :  { %1147 = vmatprep.subr.bf16.mxu0 %v2668_v9  ;;  %2123 = vmatprep.subr.bf16.mxu1 %v3249_v24 }
 0x4d9   :  { %1148 = vmatpush1.bf16.msra.mxu0 %v2671_v10  ;;  %2124 = vmatpush3.bf16.msra.mxu1 %v2731_v20 }
 0x4da   :  { %1149 = vmatprep.subr.bf16.mxu0 %v2674_v11  ;;  %2125 = vmatprep.subr.bf16.mxu1 %v3249_v24 }
 0x4dd   :  { %1150 = vmatpush1.bf16.msra.mxu0 %v2681_v12  ;;  %2126 = vmatpush3.bf16.msra.mxu1 %v2739_v21 }
 0x4de   :  { %1239 = vmatprep.subr.bf16.mxu0 %v2610_v45  ;;  %2131 = vmatprep.subr.bf16.mxu1 %v3249_v24 }
 0x593   :  { %v1065_v44 = vpop.f32.mrb[36].mxu0  ;;  %v1106_v49 = vpop.f32.mrb[44].mxu1 }
 0x594   :  { %v1112_v26 = vadd.f32 %v1065_v44, %v2801_v51  ;;  %v1067_v37 = vpop.f32.mrb[37].mxu0  ;;  %v2109_v47 = vpop.f32.mrb[45].mxu1  ;;  %v1126_v32 = vadd.f32 %v2848_v39, %v1106_v49 }
 0x595   :  { %v1119_v23 = vadd.f32 %v1067_v37, %v2806_v58  ;;  %v1069_v28 = vpop.f32.mrb[38].mxu0  ;;  %v1109_v30 = vpop.f32.mrb[46].mxu1  ;;  %v3037_v47 = vld [vmem:[#allocation4] ss:$12 sps:$4 sm:$0xff]  }
 0x596   :  { %v1871_v16 = vmul.f32 -1.442695, %v1112_v26  ;;  %v1070_v33 = vpop.f32.mrb[39].mxu0  ;;  %v2110_v22 = vpop.f32.mrb[47].mxu1  ;;  %v3052_v28 = vld [vmem:[#allocation4 + $0x34] ss:$12 sps:$4 sm:$0xff]  }
 0x597   :  { %v1872_v55 = vmul.f32 -1.442695, %v1119_v23  ;;  %v3048_v23 = vld [vmem:[#allocation4 + $0x18] ss:$12 sps:$4 sm:$0xff]   ;;  %v3072_v33 = vld [vmem:[#allocation4 + $0x60] ss:$12 sps:$4 sm:$0xff]  }
 0x598   :  { %2352 = vpow2.f32 %v1871_v16  ;;  %v3060_v30 = vld [vmem:[#allocation4 + $0x4c] ss:$12 sps:$4 sm:$0xff]   ;;  %v3064_v16 = vld [vmem:[#allocation4 + $0x48] ss:$12 sps:$4 sm:$0xff]  }
 0x599   :  { %2354 = vpow2.f32 %v1872_v55  ;;  %v3080_v22 = vld [vmem:[#allocation4 + $0x78] ss:$12 sps:$4 sm:$0xff]   ;;  %v3088_v55 = vld [vmem:[#allocation4 + $0x90] ss:$12 sps:$4 sm:$0xff]  }
 0x5a2   :  { %v2353_v50 = vpop.eup %2352 }
 0x5a3   :  { %v1116_v45 = vadd.f32 1.0, %v2353_v50  ;;  %v2355_v61 = vpop.eup %2354  ;;  %v3096_v50 = vld [vmem:[#allocation4 + $0xa8] ss:$12 sps:$4 sm:$0xff]  }
 0x5a4   :  { %v1123_v27 = vadd.f32 1.0, %v2355_v61  ;;  %v3251_v61 = vld [vmem:[#allocation8_spill] sm:$0xff] }
 0x5a5   :  { %2356 = vrcp.f32 %v1116_v45 }
 0x5a6   :  { %2358 = vrcp.f32 %v1123_v27 }
 0x5af   :  { %v2357_v51 = vpop.eup %2356 }
 0x5b0   :  { %v1127_v34 = vmul.f32 %v2357_v51, %v1126_v32  ;;  %v2359_v41 = vpop.eup %2358  ;;  %v3252_v51 = vld [vmem:[#allocation10_spill] sm:$0xff] }
 0x5b1   :  { %v1130_v0 = vsub.f32 1.0, %v2359_v41  ;;  %v1132_v36 = vmul.f32 %v2359_v41, %v2943_v31 }
 0x5b2   :  { %v1128_v58 = vadd.f32 %v1127_v34, %v2804_v53 }
 0x5b4   :  { %2360 = vtanh.f32 %v1128_v58 }
 0x5be   :  { %v2361_v42 = vpop.eup %2360 }
 0x5bf   :  { %v1131_v43 = vmul.f32 %v2361_v42, %v1130_v0 }
 0x5c1   :  { %v2987_v48 = vadd.f32 %v1132_v36, %v1131_v43 }
 0x5c3   :  { %v1134_v35 = vpack.c.bf16 %v2987_v48, %v2987_v48 }
 0x5c5   :  { %1168 = vmatmul.mubr.bf16.vlgmr.msra.gmra.mrb[40].mxu0 %v1134_v35  ;;  %2128 = vmatmul.mubr.bf16.vlgmr.msra.gmra.mrb[48].mxu1 %v1134_v35 }
 0x5c6   :  { %1240 = vmatpush1.bf16.msra.mxu0 %v2615_v52  ;;  %2132 = vmatpush3.bf16.msra.mxu1 %v2687_v13  ;;  %v3024_v52 = vld [vmem:[#allocation4 + $0x4] ss:$12 sps:$4 sm:$0xff]  }
 0x5c7   :  { %1241 = vmatprep.subr.bf16.mxu0 %v2617_v54  ;;  %2133 = vmatprep.subr.bf16.mxu1 %v3249_v24 }
 0x5c8   :  { %1271 = vmatprep.mubr.bf16.mxu0 %v3250_v38  ;;  %2147 = vmatprep.mubr.msk.bf16.mxu1 %vm2482_vm10, %v3249_v24 }
 0x5ca   :  { %1242 = vmatpush1.bf16.msra.mxu0 %v2622_v56  ;;  %2134 = vmatpush3.bf16.msra.mxu1 %v2693_v14 }
 0x5cb   :  { %1243 = vmatprep.subr.bf16.mxu0 %v2626_v59  ;;  %2135 = vmatprep.subr.bf16.mxu1 %v3249_v24 }
 0x5ce   :  { %1244 = vmatpush1.bf16.msra.mxu0 %v2632_v1  ;;  %2136 = vmatpush3.bf16.msra.mxu1 %v2701_v15 }
 0x5cf   :  { %1245 = vmatprep.subr.bf16.mxu0 %v2637_v3  ;;  %2137 = vmatprep.subr.bf16.mxu1 %v3249_v24 }
 0x5d2   :  { %1246 = vmatpush1.bf16.msra.mxu0 %v2645_v4  ;;  %2138 = vmatpush3.bf16.msra.mxu1 %v2709_v17 }
 0x5d3   :  { %1247 = vmatprep.subr.bf16.mxu0 %v2650_v5  ;;  %2139 = vmatprep.subr.bf16.mxu1 %v3249_v24 }
 0x5d6   :  { %1248 = vmatpush1.bf16.msra.mxu0 %v2653_v6  ;;  %2140 = vmatpush3.bf16.msra.mxu1 %v2716_v18 }
 0x5d7   :  { %1249 = vmatprep.subr.bf16.mxu0 %v2656_v7  ;;  %2141 = vmatprep.subr.bf16.mxu1 %v3249_v24 }
 0x5da   :  { %1250 = vmatpush1.bf16.msra.mxu0 %v2663_v8  ;;  %2142 = vmatpush3.bf16.msra.mxu1 %v2724_v19 }
 0x5db   :  { %1251 = vmatprep.subr.bf16.mxu0 %v2668_v9  ;;  %2143 = vmatprep.subr.bf16.mxu1 %v3249_v24 }
 0x5de   :  { %1252 = vmatpush1.bf16.msra.mxu0 %v2671_v10  ;;  %2144 = vmatpush3.bf16.msra.mxu1 %v2731_v20 }
 0x5df   :  { %1253 = vmatprep.subr.bf16.mxu0 %v2674_v11  ;;  %2145 = vmatprep.subr.bf16.mxu1 %v3249_v24 }
 0x5e2   :  { %1254 = vmatpush1.bf16.msra.mxu0 %v2681_v12  ;;  %2146 = vmatpush3.bf16.msra.mxu1 %v2739_v21 }
 0x5e3   :  { %1343 = vmatprep.subr.bf16.mxu0 %v3024_v52  ;;  %2151 = vmatprep.subr.bf16.mxu1 %v3249_v24 }
 0x698   :  { %v1169_v54 = vpop.f32.mrb[40].mxu0  ;;  %v1210_v56 = vpop.f32.mrb[48].mxu1 }
 0x699   :  { %v1216_v59 = vadd.f32 %v1169_v54, %v2808_v62  ;;  %v1171_v1 = vpop.f32.mrb[41].mxu0  ;;  %v2129_v3 = vpop.f32.mrb[49].mxu1  ;;  %v1230_v46 = vadd.f32 %v2848_v39, %v1210_v56 }
 0x69a   :  { %v1223_v4 = vadd.f32 %v1171_v1, %v2813_v25  ;;  %v1173_v5 = vpop.f32.mrb[42].mxu0  ;;  %v1213_v6 = vpop.f32.mrb[50].mxu1  ;;  %v3253_v1 = vld [vmem:[#allocation9_spill] sm:$0xff] }
 0x69b   :  { %v1873_v7 = vmul.f32 -1.442695, %v1216_v59  ;;  %v1174_v8 = vpop.f32.mrb[43].mxu0  ;;  %v2130_v9 = vpop.f32.mrb[51].mxu1 }
 0x69c   :  { %v1874_v10 = vmul.f32 -1.442695, %v1223_v4 }
 0x69d   :  { %2362 = vpow2.f32 %v1873_v7 }
 0x69e   :  { %2364 = vpow2.f32 %v1874_v10 }
 0x6a7   :  { %v2363_v11 = vpop.eup %2362 }
 0x6a8   :  { %v1220_v12 = vadd.f32 1.0, %v2363_v11  ;;  %v2365_v53 = vpop.eup %2364  ;;  %v2418_v11 = vld [vmem:[#allocation4 + $0x8] ss:$12 sps:$4 sm:$0xff]  }
 0x6a9   :  { %v1227_v40 = vadd.f32 1.0, %v2365_v53  ;;  %v2420_v53 = vld [vmem:[#allocation4 + $0x38] ss:$12 sps:$4 sm:$0xff]  }
 0x6aa   :  { %2366 = vrcp.f32 %v1220_v12  ;;  %v2419_v12 = vld [vmem:[#allocation4 + $0x20] ss:$12 sps:$4 sm:$0xff]  }
 0x6ab   :  { %2368 = vrcp.f32 %v1227_v40  ;;  %v2422_v40 = vld [vmem:[#allocation4 + $0x68] ss:$12 sps:$4 sm:$0xff]  }
 0x6b4   :  { %v2367_v62 = vpop.eup %2366 }
 0x6b5   :  { %v1231_v60 = vmul.f32 %v2367_v62, %v1230_v46  ;;  %v2369_v29 = vpop.eup %2368  ;;  %v2423_v46 = vld [vmem:[#allocation4 + $0x80] ss:$12 sps:$4 sm:$0xff]   ;;  %v2424_v62 = vld [vmem:[#allocation4 + $0x98] ss:$12 sps:$4 sm:$0xff]  }
 0x6b6   :  { %v1234_v31 = vsub.f32 1.0, %v2369_v29  ;;  %v1236_v49 = vmul.f32 %v2369_v29, %v2987_v48 }
 0x6b7   :  { %v1232_v25 = vadd.f32 %v1231_v60, %v2811_v63  ;;  %v3041_v63 = vld [vmem:[#allocation4 + $0x1c] ss:$12 sps:$4 sm:$0xff]  }
 0x6b8   :  { %v2425_v60 = vld [vmem:[#allocation4 + $0xb0] ss:$12 sps:$4 sm:$0xff]  }
 0x6b9   :  { %2370 = vtanh.f32 %v1232_v25 }
 0x6c3   :  { %v2371_v57 = vpop.eup %2370 }
 0x6c4   :  { %v1235_v44 = vmul.f32 %v2371_v57, %v1234_v31  ;;  %v3254_v31 = vld [vmem:[#allocation11_spill] sm:$0xff] }
 0x6c6   :  { %v3033_v26 = vadd.f32 %v1236_v49, %v1235_v44 }
 0x6c8   :  { %v1238_v37 = vpack.c.bf16 %v3033_v26, %v3033_v26 }
 0x6ca   :  { %1272 = vmatmul.mubr.bf16.vlgmr.msra.gmra.mrb[44].mxu0 %v1238_v37  ;;  %2148 = vmatmul.mubr.bf16.vlgmr.msra.gmra.mrb[52].mxu1 %v1238_v37 }
 0x6cb   :  { %1344 = vmatpush1.bf16.msra.mxu0 %v3037_v47  ;;  %2152 = vmatpush3.bf16.msra.mxu1 %v2687_v13  ;;  %v3056_v13 = vld [vmem:[#allocation4 + $0x30] ss:$12 sps:$4 sm:$0xff]  }
 0x6cc   :  { %1345 = vmatprep.subr.bf16.mxu0 %v3041_v63  ;;  %2153 = vmatprep.subr.bf16.mxu1 %v3249_v24 }
 0x6cd   :  { %1375 = vmatprep.mubr.bf16.mxu0 %v3250_v38  ;;  %2167 = vmatprep.mubr.msk.bf16.mxu1 %vm2482_vm10, %v3249_v24 }
 0x6cf   :  { %1346 = vmatpush1.bf16.msra.mxu0 %v3048_v23  ;;  %2154 = vmatpush3.bf16.msra.mxu1 %v2693_v14  ;;  %v3068_v14 = vld [vmem:[#allocation4 + $0x64] ss:$12 sps:$4 sm:$0xff]  }
 0x6d0   :  { %1347 = vmatprep.subr.bf16.mxu0 %v3052_v28  ;;  %2155 = vmatprep.subr.bf16.mxu1 %v3249_v24 }
 0x6d3   :  { %1348 = vmatpush1.bf16.msra.mxu0 %v3056_v13  ;;  %2156 = vmatpush3.bf16.msra.mxu1 %v2701_v15  ;;  %v3076_v15 = vld [vmem:[#allocation4 + $0x7c] ss:$12 sps:$4 sm:$0xff]  }
 0x6d4   :  { %1349 = vmatprep.subr.bf16.mxu0 %v3060_v30  ;;  %2157 = vmatprep.subr.bf16.mxu1 %v3249_v24 }
 0x6d7   :  { %1350 = vmatpush1.bf16.msra.mxu0 %v3064_v16  ;;  %2158 = vmatpush3.bf16.msra.mxu1 %v2709_v17  ;;  %v3084_v17 = vld [vmem:[#allocation4 + $0x94] ss:$12 sps:$4 sm:$0xff]  }
 0x6d8   :  { %1351 = vmatprep.subr.bf16.mxu0 %v3068_v14  ;;  %2159 = vmatprep.subr.bf16.mxu1 %v3249_v24 }
 0x6db   :  { %1352 = vmatpush1.bf16.msra.mxu0 %v3072_v33  ;;  %2160 = vmatpush3.bf16.msra.mxu1 %v2716_v18  ;;  %v3092_v18 = vld [vmem:[#allocation4 + $0xac] ss:$12 sps:$4 sm:$0xff]  }
 0x6dc   :  { %1353 = vmatprep.subr.bf16.mxu0 %v3076_v15  ;;  %2161 = vmatprep.subr.bf16.mxu1 %v3249_v24 }
 0x6df   :  { %1354 = vmatpush1.bf16.msra.mxu0 %v3080_v22  ;;  %2162 = vmatpush3.bf16.msra.mxu1 %v2724_v19 }
 0x6e0   :  { %1355 = vmatprep.subr.bf16.mxu0 %v3084_v17  ;;  %2163 = vmatprep.subr.bf16.mxu1 %v3249_v24 }
 0x6e3   :  { %1356 = vmatpush1.bf16.msra.mxu0 %v3088_v55  ;;  %2164 = vmatpush3.bf16.msra.mxu1 %v2731_v20 }
 0x6e4   :  { %1357 = vmatprep.subr.bf16.mxu0 %v3092_v18  ;;  %2165 = vmatprep.subr.bf16.mxu1 %v3249_v24 }
 0x6e7   :  { %1358 = vmatpush1.bf16.msra.mxu0 %v3096_v50  ;;  %2166 = vmatpush3.bf16.msra.mxu1 %v2739_v21 }
 0x6e8   :  { %1447 = vmatprep.subr.bf16.mxu0 %v3024_v52  ;;  %2171 = vmatprep.subr.bf16.mxu1 %v3249_v24 }
 0x79d   :  { %v1273_v19 = vpop.f32.mrb[44].mxu0  ;;  %v1314_v45 = vpop.f32.mrb[52].mxu1 }
 0x79e   :  { %v1320_v20 = vadd.f32 %v1273_v19, %v3251_v61  ;;  %v1275_v27 = vpop.f32.mrb[45].mxu0  ;;  %v2149_v32 = vpop.f32.mrb[53].mxu1  ;;  %v1334_v54 = vadd.f32 %v2848_v39, %v1314_v45 }
 0x79f   :  { %v1327_v34 = vadd.f32 %v1275_v27, %v3252_v51  ;;  %v1277_v58 = vpop.f32.mrb[46].mxu0  ;;  %v1317_v41 = vpop.f32.mrb[54].mxu1  ;;  %v2296_v51 = vld [vmem:[%s3233_s7 + $0x40] sm:$0xff]  }
 0x7a0   :  { %v1875_v0 = vmul.f32 -1.442695, %v1320_v20  ;;  %v1278_v42 = vpop.f32.mrb[47].mxu0  ;;  %v2150_v43 = vpop.f32.mrb[55].mxu1  ;;  %v2297_v58 = vld [vmem:[%s3233_s7 + $0x48] sm:$0xff]   ;;  %v2298_v41 = vld [vmem:[%s3233_s7 + $0x50] sm:$0xff]  }
 0x7a1   :  { %v1876_v36 = vmul.f32 -1.442695, %v1327_v34  ;;  %v2300_v42 = vld [vmem:[%s3233_s7 + $0x60] sm:$0xff]   ;;  %v2301_v43 = vld [vmem:[%s3233_s7 + $0x68] sm:$0xff]  }
 0x7a2   :  { %2372 = vpow2.f32 %v1875_v0  ;;  %v2299_v0 = vld [vmem:[%s3233_s7 + $0x58] sm:$0xff]  }
 0x7a3   :  { %2374 = vpow2.f32 %v1876_v36  ;;  %v2302_v36 = vld [vmem:[%s3233_s7 + $0x70] sm:$0xff]  }
 0x7ac   :  { %v2373_v21 = vpop.eup %2372 }
 0x7ad   :  { %v1324_v48 = vadd.f32 1.0, %v2373_v21  ;;  %v2375_v35 = vpop.eup %2374  ;;  %v2303_v21 = vld [vmem:[%s3233_s7 + $0x78] sm:$0xff]  }
 0x7ae   :  { %v1331_v52 = vadd.f32 1.0, %v2375_v35  ;;  %v2304_v35 = vld [vmem:[%s3233_s7] sm:$0xff]  }
 0x7af   :  { %2376 = vrcp.f32 %v1324_v48  ;;  %v1591_v48 = vpack.c.bf16 %v2859_v2, %v2859_v2  ;;  %v2307_v2 = vld [vmem:[%s3233_s7 + $0x18] sm:$0xff]  }
 0x7b0   :  { %2378 = vrcp.f32 %v1331_v52  ;;  %v2305_v52 = vld [vmem:[%s3233_s7 + $0x8] sm:$0xff]  }
 0x7b9   :  { %v2377_v56 = vpop.eup %2376 }
 0x7ba   :  { %v1335_v59 = vmul.f32 %v2377_v56, %v1334_v54  ;;  %v2379_v4 = vpop.eup %2378  ;;  %v2306_v54 = vld [vmem:[%s3233_s7 + $0x10] sm:$0xff]   ;;  %v2308_v56 = vld [vmem:[%s3233_s7 + $0x20] sm:$0xff]  }
 0x7bb   :  { %v1338_v5 = vsub.f32 1.0, %v2379_v4  ;;  %v1340_v8 = vmul.f32 %v2379_v4, %v3033_v26  ;;  %v3255_v26 = vld [vmem:[#allocation13_spill] sm:$0xff] }
 0x7bc   :  { %v1336_v3 = vadd.f32 %v1335_v59, %v3253_v1  ;;  %v2309_v59 = vld [vmem:[%s3233_s7 + $0x28] sm:$0xff]   ;;  %v2310_v1 = vld [vmem:[%s3233_s7 + $0x30] sm:$0xff]  }
 0x7be   :  { %2380 = vtanh.f32 %v1336_v3  ;;  %v2311_v3 = vld [vmem:[%s3233_s7 + $0x38] sm:$0xff]  }
 0x7c8   :  { %v2381_v6 = vpop.eup %2380 }
 0x7c9   :  { %v1339_v7 = vmul.f32 %v2381_v6, %v1338_v5  ;;  %v3257_v6 = vld [vmem:[#allocation14_spill] sm:$0xff] }
 0x7cb   :  { %v3107_v9 = vadd.f32 %v1340_v8, %v1339_v7 }
 0x7cd   :  { %v1342_v10 = vpack.c.bf16 %v3107_v9, %v3107_v9 }
 0x7cf   :  { %1376 = vmatmul.mubr.bf16.vlgmr.msra.gmra.mrb[48].mxu0 %v1342_v10  ;;  %2168 = vmatmul.mubr.bf16.vlgmr.msra.gmra.mrb[56].mxu1 %v1342_v10  ;;  %v3258_v10 = vld [vmem:[#allocation16_spill] sm:$0xff] }
 0x7d0   :  { %1448 = vmatpush1.bf16.msra.mxu0 %v3037_v47  ;;  %2172 = vmatpush3.bf16.msra.mxu1 %v2418_v11 }
 0x7d1   :  { %1449 = vmatprep.subr.bf16.mxu0 %v3041_v63  ;;  %2173 = vmatprep.subr.bf16.mxu1 %v3249_v24 }
 0x7d2   :  { %1479 = vmatprep.mubr.bf16.mxu0 %v3250_v38  ;;  %2187 = vmatprep.mubr.msk.bf16.mxu1 %vm2482_vm10, %v3249_v24  ;;  %v2421_v38 = vld [vmem:[#allocation4 + $0x50] ss:$12 sps:$4 sm:$0xff]  }
 0x7d4   :  { %1450 = vmatpush1.bf16.msra.mxu0 %v3048_v23  ;;  %2174 = vmatpush3.bf16.msra.mxu1 %v2419_v12 }
 0x7d5   :  { %1451 = vmatprep.subr.bf16.mxu0 %v3052_v28  ;;  %2175 = vmatprep.subr.bf16.mxu1 %v3249_v24 }
 0x7d8   :  { %1452 = vmatpush1.bf16.msra.mxu0 %v3056_v13  ;;  %2176 = vmatpush3.bf16.msra.mxu1 %v2420_v53 }
 0x7d9   :  { %1453 = vmatprep.subr.bf16.mxu0 %v3060_v30  ;;  %2177 = vmatprep.subr.bf16.mxu1 %v3249_v24 }
 0x7dc   :  { %1454 = vmatpush1.bf16.msra.mxu0 %v3064_v16  ;;  %2178 = vmatpush3.bf16.msra.mxu1 %v2421_v38 }
 0x7dd   :  { %1455 = vmatprep.subr.bf16.mxu0 %v3068_v14  ;;  %2179 = vmatprep.subr.bf16.mxu1 %v3249_v24 }
 0x7e0   :  { %1456 = vmatpush1.bf16.msra.mxu0 %v3072_v33  ;;  %2180 = vmatpush3.bf16.msra.mxu1 %v2422_v40 }
 0x7e1   :  { %1457 = vmatprep.subr.bf16.mxu0 %v3076_v15  ;;  %2181 = vmatprep.subr.bf16.mxu1 %v3249_v24 }
 0x7e4   :  { %1458 = vmatpush1.bf16.msra.mxu0 %v3080_v22  ;;  %2182 = vmatpush3.bf16.msra.mxu1 %v2423_v46 }
 0x7e5   :  { %1459 = vmatprep.subr.bf16.mxu0 %v3084_v17  ;;  %2183 = vmatprep.subr.bf16.mxu1 %v3249_v24 }
 0x7e8   :  { %1460 = vmatpush1.bf16.msra.mxu0 %v3088_v55  ;;  %2184 = vmatpush3.bf16.msra.mxu1 %v2424_v62 }
 0x7e9   :  { %1461 = vmatprep.subr.bf16.mxu0 %v3092_v18  ;;  %2185 = vmatprep.subr.bf16.mxu1 %v3249_v24  ;;  %v3256_v18 = vld [vmem:[#allocation12_spill] sm:$0xff] }
 0x7ec   :  { %1462 = vmatpush1.bf16.msra.mxu0 %v3096_v50  ;;  %2186 = vmatpush3.bf16.msra.mxu1 %v2425_v60 }
 0x7ed   :  { %2191 = vmatprep.subr.bf16.mxu0 %v3249_v24  ;;  %2211 = vmatprep.subr.bf16.mxu1 %v3249_v24 }
 0x8a2   :  { %v1377_v25 = vpop.f32.mrb[48].mxu0  ;;  %v1418_v29 = vpop.f32.mrb[56].mxu1 }
 0x8a3   :  { %v1424_v57 = vadd.f32 %v1377_v25, %v3254_v31  ;;  %v1379_v44 = vpop.f32.mrb[49].mxu0  ;;  %v2169_v49 = vpop.f32.mrb[57].mxu1  ;;  %v1438_v22 = vadd.f32 %v2848_v39, %v1418_v29 }
 0x8a4   :  { %v1431_v37 = vadd.f32 %v1379_v44, %v3255_v26  ;;  %v1381_v47 = vpop.f32.mrb[50].mxu0  ;;  %v1421_v63 = vpop.f32.mrb[58].mxu1  ;;  %v3259_v49 = vld [vmem:[#allocation15_spill] sm:$0xff] }
 0x8a5   :  { %v1877_v23 = vmul.f32 -1.442695, %v1424_v57  ;;  %v1382_v28 = vpop.f32.mrb[51].mxu0  ;;  %v2170_v13 = vpop.f32.mrb[59].mxu1 }
 0x8a6   :  { %v1878_v30 = vmul.f32 -1.442695, %v1431_v37 }
 0x8a7   :  { %2382 = vpow2.f32 %v1877_v23 }
 0x8a8   :  { %2384 = vpow2.f32 %v1878_v30 }
 0x8b1   :  { %v2383_v16 = vpop.eup %2382 }
 0x8b2   :  { %v1428_v14 = vadd.f32 1.0, %v2383_v16  ;;  %v2385_v33 = vpop.eup %2384 }
 0x8b3   :  { %v1435_v15 = vadd.f32 1.0, %v2385_v33 }
 0x8b4   :  { %2386 = vrcp.f32 %v1428_v14 }
 0x8b5   :  { %2388 = vrcp.f32 %v1435_v15 }
 0x8be   :  { %v2387_v17 = vpop.eup %2386 }
 0x8bf   :  { %v1439_v55 = vmul.f32 %v2387_v17, %v1438_v22  ;;  %v2389_v19 = vpop.eup %2388  ;;  %v1916_v22 = vld [vmem:[%s3234_s8] ss:$0 sm:$0xff] }
 0x8c0   :  { %v1442_v45 = vsub.f32 1.0, %v2389_v19  ;;  %v1444_v27 = vmul.f32 %v2389_v19, %v3107_v9 }
 0x8c1   :  { %v1440_v50 = vadd.f32 %v1439_v55, %v3256_v18 }
 0x8c3   :  { %2390 = vtanh.f32 %v1440_v50 }
 0x8cd   :  { %v2391_v61 = vpop.eup %2390 }
 0x8ce   :  { %v1443_v20 = vmul.f32 %v2391_v61, %v1442_v45 }
 0x8d0   :  { %v3143_v32 = vadd.f32 %v1444_v27, %v1443_v20 }
 0x8d2   :  { %v1446_v34 = vpack.c.bf16 %v3143_v32, %v3143_v32 }
 0x8d4   :  { %1480 = vmatmul.mubr.bf16.vlgmr.msra.gmra.mrb[52].mxu0 %v1446_v34  ;;  %2188 = vmatmul.mubr.bf16.vlgmr.msra.gmra.mrb[60].mxu1 %v1446_v34 }
 0x8d5   :  { %2192 = vmatpush3.bf16.msra.mxu0 %v2296_v51  ;;  %2207 = vmatprep.mubr.msk.bf16.mxu0 %vm2482_vm10, %v3249_v24 }
 0x8d6   :  { %2193 = vmatprep.subr.bf16.mxu0 %v3249_v24  ;;  %2227 = vmatprep.mubr.msk.bf16.mxu1 %vm2482_vm10, %v3249_v24 }
 0x8d7   :  { %2212 = vmatpush3.bf16.msra.mxu1 %v2304_v35 }
 0x8d8   :  { %2213 = vmatprep.subr.bf16.mxu1 %v3249_v24 }
 0x8d9   :  { %2194 = vmatpush3.bf16.msra.mxu0 %v2297_v58 }
 0x8da   :  { %2195 = vmatprep.subr.bf16.mxu0 %v3249_v24 }
 0x8db   :  { %2214 = vmatpush3.bf16.msra.mxu1 %v2305_v52 }
 0x8dc   :  { %2215 = vmatprep.subr.bf16.mxu1 %v3249_v24 }
 0x8dd   :  { %2196 = vmatpush3.bf16.msra.mxu0 %v2298_v41 }
 0x8de   :  { %2197 = vmatprep.subr.bf16.mxu0 %v3249_v24 }
 0x8df   :  { %2216 = vmatpush3.bf16.msra.mxu1 %v2306_v54 }
 0x8e0   :  { %2217 = vmatprep.subr.bf16.mxu1 %v3249_v24 }
 0x8e1   :  { %2198 = vmatpush3.bf16.msra.mxu0 %v2299_v0 }
 0x8e2   :  { %2199 = vmatprep.subr.bf16.mxu0 %v3249_v24 }
 0x8e3   :  { %2218 = vmatpush3.bf16.msra.mxu1 %v2307_v2 }
 0x8e4   :  { %2219 = vmatprep.subr.bf16.mxu1 %v3249_v24 }
 0x8e5   :  { %2200 = vmatpush3.bf16.msra.mxu0 %v2300_v42 }
 0x8e6   :  { %2201 = vmatprep.subr.bf16.mxu0 %v3249_v24 }
 0x8e7   :  { %2220 = vmatpush3.bf16.msra.mxu1 %v2308_v56 }
 0x8e8   :  { %2221 = vmatprep.subr.bf16.mxu1 %v3249_v24 }
 0x8e9   :  { %2202 = vmatpush3.bf16.msra.mxu0 %v2301_v43 }
 0x8ea   :  { %2203 = vmatprep.subr.bf16.mxu0 %v3249_v24 }
 0x8eb   :  { %2222 = vmatpush3.bf16.msra.mxu1 %v2309_v59 }
 0x8ec   :  { %2223 = vmatprep.subr.bf16.mxu1 %v3249_v24 }
 0x8ed   :  { %2204 = vmatpush3.bf16.msra.mxu0 %v2302_v36 }
 0x8ee   :  { %2205 = vmatprep.subr.bf16.mxu0 %v3249_v24 }
 0x8ef   :  { %2224 = vmatpush3.bf16.msra.mxu1 %v2310_v1 }
 0x8f0   :  { %2225 = vmatprep.subr.bf16.mxu1 %v3249_v24 }
 0x8f1   :  { %2206 = vmatpush3.bf16.msra.mxu0 %v2303_v21 }
 0x8f3   :  { %2226 = vmatpush3.bf16.msra.mxu1 %v2311_v3 }
 0x8f4   :  { %2208 = vmatmul.mubr.bf16.vlgmr.msra.gmra.mrb[56].mxu0 %v1591_v48 }
 0x9a7   :  { %v1481_v4 = vpop.f32.mrb[52].mxu0  ;;  %v1522_v5 = vpop.f32.mrb[60].mxu1 }
 0x9a8   :  { %v1528_v7 = vadd.f32 %v1481_v4, %v3257_v6  ;;  %v1483_v8 = vpop.f32.mrb[53].mxu0  ;;  %v2189_v9 = vpop.f32.mrb[61].mxu1  ;;  %v1542_v31 = vadd.f32 %v2848_v39, %v1522_v5 }
 0x9a9   :  { %v1535_v11 = vadd.f32 %v1483_v8, %v3258_v10  ;;  %v1485_v12 = vpop.f32.mrb[54].mxu0  ;;  %v1525_v53 = vpop.f32.mrb[62].mxu1 }
 0x9aa   :  { %v1879_v38 = vmul.f32 -1.442695, %v1528_v7  ;;  %v1486_v40 = vpop.f32.mrb[55].mxu0  ;;  %v2190_v46 = vpop.f32.mrb[63].mxu1 }
 0x9ab   :  { %v1880_v62 = vmul.f32 -1.442695, %v1535_v11 }
 0x9ac   :  { %2392 = vpow2.f32 %v1879_v38 }
 0x9ad   :  { %2394 = vpow2.f32 %v1880_v62 }
 0x9b6   :  { %v2393_v60 = vpop.eup %2392 }
 0x9b7   :  { %v1532_v25 = vadd.f32 1.0, %v2393_v60  ;;  %v2395_v24 = vpop.eup %2394 }
 0x9b8   :  { %v1539_v29 = vadd.f32 1.0, %v2395_v24 }
 0x9b9   :  { %2396 = vrcp.f32 %v1532_v25 }
 0x9ba   :  { %2398 = vrcp.f32 %v1539_v29 }
 0x9c3   :  { %v2397_v57 = vpop.eup %2396 }
 0x9c4   :  { %v1543_v44 = vmul.f32 %v2397_v57, %v1542_v31  ;;  %v2399_v28 = vpop.eup %2398 }
 0x9c5   :  { %v1546_v13 = vsub.f32 1.0, %v2399_v28  ;;  %v1548_v14 = vmul.f32 %v2399_v28, %v3143_v32 }
 0x9c6   :  { %v1544_v26 = vadd.f32 %v1543_v44, %v3259_v49 }
 0x9c7   :  { %v1691_v37 = vpop.f32.mrb[56].mxu0 }
 0x9c8   :  { %2400 = vtanh.f32 %v1544_v26  ;;  %v2209_v47 = vpop.f32.mrb[57].mxu0 }
 0x9c9   :  { %v1694_v63 = vpop.f32.mrb[58].mxu0 }
 0x9ca   :  { %v2210_v23 = vpop.f32.mrb[59].mxu0 }
 0x9d2   :  { %v2401_v30 = vpop.eup %2400 }
 0x9d3   :  { %v1547_v16 = vmul.f32 %v2401_v30, %v1546_v13 }
 0x9d5   :  { %v1549_v33 = vadd.f32 %v1548_v14, %v1547_v16 }
 0x9d7   :  { %v1574_v15 = vpack.c.bf16 %v1549_v33, %v1549_v33 }
 0x9d9   :  { %2228 = vmatmul.mubr.bf16.vlgmr.msra.gmra.mrb[64].mxu1 %v1574_v15 }
 0xaac   :  { %v1779_v39 = vpop.f32.mrb[64].mxu1 }
 0xaad   :  { %v1780_v17 = vadd.f32 %v1779_v39, %v1691_v37  ;;  %v2229_v55 = vpop.f32.mrb[65].mxu1 }
 0xaae   :  { %v1782_v18 = vpop.f32.mrb[66].mxu1 }
 0xaaf   :  { %v1792_v50 = vadd.f32 %v1916_v22, %v1780_v17  ;;  %v2230_v19 = vpop.f32.mrb[67].mxu1 }
 0xab1   :  { %1793 = vst [vmem:[%s3235_s9] sm:$0xff] %v1792_v50 }
 0xab2   :  { %1798 = vsyncpa [#allocation3], 1 }
 0xab3   :  { %1799 = vsyncpa [#allocation5], 1 }

</bundles_post_ra>
